<compile_context>
chip_gen: v7x
topology: tpu7x:2x2x1
jax: 0.10.0
libtpu: 0.0.40
codegen_flags: <defaults>
</compile_context>

<pallas_src>
import functools

import jax
import jax.numpy as jnp
from jax import lax
from jax.experimental import pallas as pl
from jax.experimental.pallas import tpu as pltpu

EPS = 1e-5


# --------------------------------------------------------------------- in-kernel BN
def _partial_stats(y):
    """Per-image BN partial stats from the f32 accumulator: (sum, centered sum-sq).

    Two-pass within the image (y is already resident in vregs) -> no large-sum
    cancellation; images are folded exactly with Chan's formula in _bn_affine."""
    hw = y.shape[1]
    s = jnp.sum(y, axis=1, keepdims=True)                      # (C, 1)
    mu = s * (1.0 / hw)
    css = jnp.sum((y - mu) * (y - mu), axis=1, keepdims=True)  # (C, 1)
    return jnp.concatenate([s, css], axis=1)                   # (C, 2)


# --------------------------------------------------------------------------- kernels
def stage1_kernel(x_ref, w1_ref, y1_ref, s1_ref):
    """conv1 (1x1) + per-image partial BN1 stats for one image."""
    x = x_ref[0].astype(w1_ref.dtype)                                   # (Cin, HW)
    y = jnp.dot(w1_ref[...], x, preferred_element_type=jnp.float32)     # (P, HW) f32
    y1_ref[0] = y.astype(y1_ref.dtype)           # bf16 store in the perf path
    s1_ref[0] = _partial_stats(y)                # stats from the f32 accumulator


def stage2_kernel(W, y1_ref, sc_ref, sh_ref, w2_ref, ml_ref, mr_ref,
                  y2_ref, s2_ref, pbuf):
    """bn1(affine)+relu -> conv2 (3x3, pad=1) as 9 accumulated MXU taps + BN2 stats."""
    Pc = y1_ref.shape[1]
    HW = y1_ref.shape[2]
    off = W + 1                                                  # image origin in pbuf

    # bn1 + relu in f32 (VPU work stays f32 -> v5e friendly); one cast for the MXU.
    a = jnp.maximum(y1_ref[0].astype(jnp.float32) * sc_ref[...] + sh_ref[...], 0.0)

    # Row-zero-padded flat buffer: [0..off) zeros | image | [off+HW..off+HW+off) zeros.
    # Pad init stays per-step: under ("parallel",) sharding each core owns a private
    # scratch and its own first iteration, so a program_id==0 guard would be unsafe.
    zpad = jnp.zeros((Pc, off), pbuf.dtype)
    pbuf[:, 0:off] = zpad
    pbuf[:, off + HW:off + HW + off] = zpad
    pbuf[:, off:off + HW] = a.astype(pbuf.dtype)

    # 3x3 conv = 9 accumulated (P,P)x(P,HW) matmuls reading tap slices of pbuf directly
    # (no im2col materialization).  Column-wrap masking commutes with the channel
    # contraction, so it is applied ONCE per kj group on the f32 accumulator.
    def conv_group(kj):
        acc = None
        for ki in (-1, 0, 1):
            k = (ki + 1) * 3 + (kj + 1)                          # static tap index
            s = off + ki * W + kj
            d = jnp.dot(w2_ref[k], pbuf[:, s:s + HW],
                        preferred_element_type=jnp.float32)
            acc = d if acc is None else acc + d
        return acc

    y = conv_group(0) + conv_group(-1) * ml_ref[...] + conv_group(1) * mr_ref[...]

    y2_ref[0] = y.astype(y2_ref.dtype)
    s2_ref[0] = _partial_stats(y)


def stage3_kernel(y2_ref, sc_ref, sh_ref, w3_ref, y3_ref, s3_ref):
    """bn2(affine)+relu -> conv3 (1x1) + per-image partial BN3 stats."""
    a = jnp.maximum(y2_ref[0].astype(jnp.float32) * sc_ref[...] + sh_ref[...], 0.0)
    y = jnp.dot(w3_ref[...], a.astype(w3_ref.dtype),
                preferred_element_type=jnp.float32)              # (4P, HW) f32
    y3_ref[0] = y.astype(y3_ref.dtype)
    s3_ref[0] = _partial_stats(y)


def stage4_kernel(y3_ref, x_ref, sc_ref, sh_ref, o_ref):
    """bn3(affine) + identity residual + relu."""
    y = y3_ref[0].astype(jnp.float32)
    r = x_ref[0].astype(jnp.float32)
    o_ref[0] = jnp.maximum(y * sc_ref[...] + sh_ref[...] + r, 0.0).astype(o_ref.dtype)


# ---------------------------------------------------------------- stats finalization
def _bn_affine(partial_stats, gamma, beta, hw):
    """Fold per-image (sum, centered sumsq) into per-channel scale/shift (training BN)."""
    n = partial_stats.shape[0]
    m_total = n * hw
    s = partial_stats[..., 0]                                    # (N, C) per-image sums
    css = partial_stats[..., 1]                                  # (N, C) centered sumsq
    mean = jnp.sum(s, axis=0) / m_total                          # (C,)
    mean_i = s / hw                                              # (N, C)
    # Chan parallel combination -> exact biased variance, no large-sum cancellation.
    var = (jnp.sum(css, axis=0)
           + hw * jnp.sum((mean_i - mean[None, :]) ** 2, axis=0)) / m_total
    var = jnp.maximum(var, 0.0)
    inv = 1.0 / jnp.sqrt(var + EPS)
    scale = gamma.astype(jnp.float32) * inv
    shift = beta.astype(jnp.float32) - mean * scale
    return scale.reshape(-1, 1), shift.reshape(-1, 1)


def _vmem_limit_bytes():
    """Generation-aware VMEM request: at most half of physical VMEM (64 MiB/TC on v7x,
    128 MiB on v5e/v6e), leaving headroom for compiler scratch and double-buffering."""
    try:
        cap = int(getattr(pltpu.get_tpu_info(), "vmem_capacity_bytes",
                          128 * 1024 * 1024))
    except Exception:
        cap = 64 * 1024 * 1024
    return int(min(48 * 1024 * 1024, max(16 * 1024 * 1024, cap // 2)))


# -------------------------------------------------------------------------- wrapper
@functools.partial(jax.jit, static_argnames=("mxu_dtype",))
def bottleneck_forward(x_nchw, params, mxu_dtype=jnp.bfloat16):
    N, Cin, H, W = x_nchw.shape
    HW = H * W
    P = params['w1'].shape[0]
    Cout = params['w3'].shape[0]
    assert Cout == Cin, "identity residual requires inplanes == planes * expansion"

    # Inter-stage activations stored in the MXU dtype (bf16 in the perf path -> halves
    # inter-stage HBM traffic); f32 verification path is unchanged.
    act_dtype = mxu_dtype
    out_dtype = x_nchw.dtype

    # NCHW -> (N, C, H*W): free reshape, no transpose.  Per-image (C, HW) slabs are
    # lane-dense for HW >= 128 feature maps (56x56 / 28x28 / 16x16).
    # TODO(synk): pack multiple images along the lane axis for 7x7 maps (HW=49).
    x = x_nchw.reshape(N, Cin, HW)

    w1 = params['w1'].reshape(P, Cin).astype(mxu_dtype)                      # (P, Cin)
    # (O, I, 3, 3) -> (kh, kw, O, I) -> (9, O, I): per-tap weights for accumulated taps.
    w2 = jnp.transpose(params['w2'], (2, 3, 0, 1)).reshape(9, P, P).astype(mxu_dtype)
    w3 = params['w3'].reshape(Cout, P).astype(mxu_dtype)                     # (4P, P)

    # Column-wrap masks (f32, applied to the f32 accumulators), hoisted out of the kernel.
    col = jnp.arange(HW, dtype=jnp.int32) % W
    mask_l = (col != 0).astype(jnp.float32).reshape(1, HW)
    mask_r = (col != W - 1).astype(jnp.float32).reshape(1, HW)

    cparams = pltpu.CompilerParams(
        dimension_semantics=("parallel",),               # megacore sharding on v7x
        vmem_limit_bytes=_vmem_limit_bytes())

    abytes = jnp.dtype(act_dtype).itemsize
    wbytes = jnp.dtype(mxu_dtype).itemsize
    xbytes = jnp.dtype(x.dtype).itemsize
    obytes = jnp.dtype(out_dtype).itemsize

    def img_spec(c):
        return pl.BlockSpec((1, c, HW), lambda n: (n, 0, 0))

    def rep_spec(shape):
        return pl.BlockSpec(shape, lambda n: (0,) * len(shape))

    def stat_spec(c):
        return pl.BlockSpec((1, c, 2), lambda n: (n, 0, 0))

    def cost(flops, nbytes):
        return pl.CostEstimate(flops=int(flops), transcendentals=0,
                               bytes_accessed=int(nbytes))

    # ---- stage 1: conv1 (1x1) + partial BN1 stats -------------------------------
    y1, s1 = pl.pallas_call(
        stage1_kernel,
        grid=(N,),
        in_specs=[img_spec(Cin), rep_spec((P, Cin))],
        out_specs=[img_spec(P), stat_spec(P)],
        out_shape=[jax.ShapeDtypeStruct((N, P, HW), act_dtype),
                   jax.ShapeDtypeStruct((N, P, 2), jnp.float32)],
        compiler_params=cparams,
        cost_estimate=cost(2 * N * P * Cin * HW,
                           N * Cin * HW * xbytes + P * Cin * wbytes
                           + N * P * HW * abytes + N * P * 8),
    )(x, w1)
    sc1, sh1 = _bn_affine(s1, params['g1'], params['b1'], HW)

    # ---- stage 2: bn1+relu -> conv2 (3x3, 9 accumulated taps) + partial BN2 stats -
    lpad = HW + 2 * (W + 1)
    y2, s2 = pl.pallas_call(
        functools.partial(stage2_kernel, W),
        grid=(N,),
        in_specs=[img_spec(P), rep_spec((P, 1)), rep_spec((P, 1)),
                  rep_spec((9, P, P)), rep_spec((1, HW)), rep_spec((1, HW))],
        out_specs=[img_spec(P), stat_spec(P)],
        out_shape=[jax.ShapeDtypeStruct((N, P, HW), act_dtype),
                   jax.ShapeDtypeStruct((N, P, 2), jnp.float32)],
        scratch_shapes=[pltpu.VMEM((P, lpad), mxu_dtype)],
        input_output_aliases={0: 0},                     # y2 overwrites y1's buffer
        compiler_params=cparams,
        cost_estimate=cost(2 * N * 9 * P * P * HW,
                           2 * N * P * HW * abytes + 9 * P * P * wbytes
                           + 2 * HW * 4 + N * P * 8 + 2 * P * 4),
    )(y1, sc1, sh1, w2, mask_l, mask_r)
    sc2, sh2 = _bn_affine(s2, params['g2'], params['b2'], HW)

    # ---- stage 3: bn2+relu -> conv3 (1x1) + partial BN3 stats -------------------
    y3, s3 = pl.pallas_call(
        stage3_kernel,
        grid=(N,),
        in_specs=[img_spec(P), rep_spec((P, 1)), rep_spec((P, 1)),
                  rep_spec((Cout, P))],
        out_specs=[img_spec(Cout), stat_spec(Cout)],
        out_shape=[jax.ShapeDtypeStruct((N, Cout, HW), act_dtype),
                   jax.ShapeDtypeStruct((N, Cout, 2), jnp.float32)],
        compiler_params=cparams,
        cost_estimate=cost(2 * N * Cout * P * HW,
                           N * P * HW * abytes + Cout * P * wbytes
                           + N * Cout * HW * abytes + N * Cout * 8),
    )(y2, sc2, sh2, w3)
    sc3, sh3 = _bn_affine(s3, params['g3'], params['b3'], HW)

    # ---- stage 4: bn3 + residual + relu ----------------------------------------
    alias4 = {0: 0} if act_dtype == out_dtype else {}    # alias only when dtypes match
    out = pl.pallas_call(
        stage4_kernel,
        grid=(N,),
        in_specs=[img_spec(Cout), img_spec(Cin),
                  rep_spec((Cout, 1)), rep_spec((Cout, 1))],
        out_specs=img_spec(Cout),
        out_shape=jax.ShapeDtypeStruct((N, Cout, HW), out_dtype),
        input_output_aliases=alias4,
        compiler_params=cparams,
        cost_estimate=cost(4 * N * Cout * HW,
                           N * Cout * HW * (abytes + xbytes + obytes)),
    )(y3, x, sc3, sh3)

    return out.reshape(N, Cout, H, W)


# ----------------------------------------------------------------- pure-JAX reference
def _ref_bn(y, g, b):
    mean = y.mean(axis=(0, 2, 3), keepdims=True)
    var = ((y - mean) ** 2).mean(axis=(0, 2, 3), keepdims=True)
    return (y - mean) / jnp.sqrt(var + EPS) * g.reshape(1, -1, 1, 1) + b.reshape(1, -1, 1, 1)


def bottleneck_reference(x, p):
    dn = ('NCHW', 'OIHW', 'NCHW')
    y = lax.conv_general_dilated(x, p['w1'], (1, 1), 'VALID', dimension_numbers=dn)
    y = jax.nn.relu(_ref_bn(y, p['g1'], p['b1']))
    y = lax.conv_general_dilated(y, p['w2'], (1, 1), ((1, 1), (1, 1)), dimension_numbers=dn)
    y = jax.nn.relu(_ref_bn(y, p['g2'], p['b2']))
    y = lax.conv_general_dilated(y, p['w3'], (1, 1), 'VALID', dimension_numbers=dn)
    y = _ref_bn(y, p['g3'], p['b3'])
    return jax.nn.relu(y + x)


if __name__ == "__main__":
    # Small shapes consistent with the module: inplanes = planes * expansion so the
    # identity residual is valid (stride=1, downsample=None, attention='0').
    N, planes, H, W = 2, 4, 16, 16
    expansion = 4
    inplanes = planes * expansion        # 16

    key = jax.random.PRNGKey(0)
    ks = jax.random.split(key, 10)
    params = {
        'w1': 0.1 * jax.random.normal(ks[0], (planes, inplanes, 1, 1), jnp.float32),
        'g1': 1.0 + 0.1 * jax.random.normal(ks[1], (planes,), jnp.float32),
        'b1': 0.1 * jax.random.normal(ks[2], (planes,), jnp.float32),
        'w2': 0.1 * jax.random.normal(ks[3], (planes, planes, 3, 3), jnp.float32),
        'g2': 1.0 + 0.1 * jax.random.normal(ks[4], (planes,), jnp.float32),
        'b2': 0.1 * jax.random.normal(ks[5], (planes,), jnp.float32),
        'w3': 0.1 * jax.random.normal(ks[6], (planes * expansion, planes, 1, 1), jnp.float32),
        'g3': 1.0 + 0.1 * jax.random.normal(ks[7], (planes * expansion,), jnp.float32),
        'b3': 0.1 * jax.random.normal(ks[8], (planes * expansion,), jnp.float32),
    }
    x = jax.random.normal(ks[9], (N, inplanes, H, W), jnp.float32)

    ref = jax.block_until_ready(bottleneck_reference(x, params))

    # f32-MXU path: verifies the algorithm (padded tap conv, Chan-combined BN, residual,
    # f32 activations end-to-end, both input_output_aliases active).
    out_f32 = jax.block_until_ready(bottleneck_forward(x, params, mxu_dtype=jnp.float32))
    assert out_f32.shape == ref.shape == (N, inplanes, H, W)
    err32 = float(jnp.max(jnp.abs(out_f32 - ref)))
    assert jnp.allclose(out_f32, ref, rtol=2e-3, atol=2e-3), f"f32 max abs err = {err32}"

    # bf16 performance path: bf16 MXU operands AND bf16 inter-stage activations, so a
    # looser tolerance from double rounding across three BN-normalized stages.
    out_bf16 = jax.block_until_ready(bottleneck_forward(x, params, mxu_dtype=jnp.bfloat16))
    errbf = float(jnp.max(jnp.abs(out_bf16 - ref)))
    assert jnp.allclose(out_bf16, ref, rtol=1e-1, atol=1e-1), f"bf16 max abs err = {errbf}"

    # TODO(synk): attention branches '1','2','+','M','&' (chan_att/pos_att, MPNCOV
    # covariance pooling), stride>1 and the downsample path are dead code for the
    # default attention='0' forward and are not implemented.
    print("KERNEL_OK")
</pallas_src>

<mosaic_0001>
module attributes {stable_mosaic.version = 11 : i64} {
  func.func @stage1_kernel(%arg0: i32, %arg1: memref<1x16x256xf32, #tpu.memory_space<vmem>>, %arg2: memref<4x16xf32, #tpu.memory_space<vmem>>, %arg3: memref<1x4x256xf32, #tpu.memory_space<vmem>>, %arg4: memref<1x4x2xf32, #tpu.memory_space<vmem>>) attributes {dimension_semantics = [#tpu.dimension_semantics<parallel>], iteration_bounds = array<i64: 2>, scalar_prefetch = 0 : i64, scratch_operands = 0 : i64, tpu.core_type = #tpu.core_type<tc>, window_params = [{transform_indices = @transform_0, window_bounds = array<i64: 1, 16, 256>}, {pipeline_mode = #tpu.pipeline_mode<synchronous>, transform_indices = @transform_1, window_bounds = array<i64: 4, 16>}, {transform_indices = @transform_2, window_bounds = array<i64: 1, 4, 256>}, {transform_indices = @transform_3, window_bounds = array<i64: 1, 4, 2>}]} {
    %c0 = arith.constant 0 : index
    %c0_0 = arith.constant 0 : index
    %c0_1 = arith.constant 0 : index
    %0 = vector.load %arg1[%c0, %c0_0, %c0_1] : memref<1x16x256xf32, #tpu.memory_space<vmem>>, vector<1x16x256xf32>
    %1 = vector.shape_cast %0 : vector<1x16x256xf32> to vector<16x256xf32>
    %c0_2 = arith.constant 0 : index
    %c0_3 = arith.constant 0 : index
    %2 = vector.load %arg2[%c0_2, %c0_3] : memref<4x16xf32, #tpu.memory_space<vmem>>, vector<4x16xf32>
    %cst = arith.constant dense<0.000000e+00> : vector<4x256xf32>
    %3 = tpu.matmul %2, %1, %cst {dimension_numbers = #tpu.dot_dimension_numbers<[1], [0], [0], [1], [0, 0, 1, 1], [], []>} : vector<4x16xf32>, vector<16x256xf32>, vector<4x256xf32> -> vector<4x256xf32>
    %c0_4 = arith.constant 0 : index
    %c0_5 = arith.constant 0 : index
    %c0_6 = arith.constant 0 : index
    %4 = vector.load %arg3[%c0_4, %c0_5, %c0_6] : memref<1x4x256xf32, #tpu.memory_space<vmem>>, vector<1x4x256xf32>
    %5 = vector.shape_cast %4 : vector<1x4x256xf32> to vector<4x256xf32>
    %6 = vector.shape_cast %3 : vector<4x256xf32> to vector<1x4x256xf32>
    tpu.vector_store %arg3[%c0_4, %c0_5, %c0_6], %6 {strides = array<i32>} : memref<1x4x256xf32, #tpu.memory_space<vmem>>, vector<1x4x256xf32>,
    %cst_7 = arith.constant dense<0.000000e+00> : vector<4xf32>
    %7 = vector.multi_reduction <add>, %3, %cst_7 [1] : vector<4x256xf32> to vector<4xf32>
    %8 = vector.shape_cast %7 : vector<4xf32> to vector<4x1xf32>
    %cst_8 = arith.constant 3.906250e-03 : f32
    %9 = vector.broadcast %cst_8 : f32 to vector<4x1xf32>
    %10 = arith.mulf %8, %9 : vector<4x1xf32>
    %11 = vector.broadcast %10 : vector<4x1xf32> to vector<4x256xf32>
    %12 = arith.subf %3, %11 : vector<4x256xf32>
    %13 = vector.broadcast %10 : vector<4x1xf32> to vector<4x256xf32>
    %14 = arith.subf %3, %13 : vector<4x256xf32>
    %15 = arith.mulf %12, %14 : vector<4x256xf32>
    %cst_9 = arith.constant dense<0.000000e+00> : vector<4xf32>
    %16 = vector.multi_reduction <add>, %15, %cst_9 [1] : vector<4x256xf32> to vector<4xf32>
    %17 = vector.shape_cast %16 : vector<4xf32> to vector<4x1xf32>
    %18 = tpu.concatenate %8, %17 in 1 : vector<4x1xf32>, vector<4x1xf32> -> vector<4x2xf32>
    %c0_10 = arith.constant 0 : index
    %c0_11 = arith.constant 0 : index
    %c0_12 = arith.constant 0 : index
    %19 = vector.load %arg4[%c0_10, %c0_11, %c0_12] : memref<1x4x2xf32, #tpu.memory_space<vmem>>, vector<1x4x2xf32>
    %20 = vector.shape_cast %19 : vector<1x4x2xf32> to vector<4x2xf32>
    %21 = vector.shape_cast %18 : vector<4x2xf32> to vector<1x4x2xf32>
    tpu.vector_store %arg4[%c0_10, %c0_11, %c0_12], %21 {strides = array<i32>} : memref<1x4x2xf32, #tpu.memory_space<vmem>>, vector<1x4x2xf32>,
    return
  }
  func.func @transform_0(%arg0: i32) -> (i32, i32, i32) {
    %c0_i32 = arith.constant 0 : i32
    %c0_i32_0 = arith.constant 0 : i32
    %c0_i32_1 = arith.constant 0 : i32
    return %arg0, %c0_i32, %c0_i32_0 : i32, i32, i32
  }
  func.func @transform_1(%arg0: i32) -> (i32, i32) {
    %c0_i32 = arith.constant 0 : i32
    %c0_i32_0 = arith.constant 0 : i32
    %c0_i32_1 = arith.constant 0 : i32
    return %c0_i32, %c0_i32_0 : i32, i32
  }
  func.func @transform_2(%arg0: i32) -> (i32, i32, i32) {
    %c0_i32 = arith.constant 0 : i32
    %c0_i32_0 = arith.constant 0 : i32
    %c0_i32_1 = arith.constant 0 : i32
    return %arg0, %c0_i32, %c0_i32_0 : i32, i32, i32
  }
  func.func @transform_3(%arg0: i32) -> (i32, i32, i32) {
    %c0_i32 = arith.constant 0 : i32
    %c0_i32_0 = arith.constant 0 : i32
    %c0_i32_1 = arith.constant 0 : i32
    return %arg0, %c0_i32, %c0_i32_0 : i32, i32, i32
  }
}

module attributes {stable_mosaic.version = 11 : i64} {
  func.func @stage2_kernel(%arg0: i32, %arg1: memref<1x4x256xf32, #tpu.memory_space<vmem>>, %arg2: memref<4x1xf32, #tpu.memory_space<vmem>>, %arg3: memref<4x1xf32, #tpu.memory_space<vmem>>, %arg4: memref<9x4x4xf32, #tpu.memory_space<vmem>>, %arg5: memref<1x256xf32, #tpu.memory_space<vmem>>, %arg6: memref<1x256xf32, #tpu.memory_space<vmem>>, %arg7: memref<1x4x256xf32, #tpu.memory_space<vmem>>, %arg8: memref<1x4x2xf32, #tpu.memory_space<vmem>>, %arg9: memref<4x290xf32, #tpu.memory_space<vmem>>) attributes {dimension_semantics = [#tpu.dimension_semantics<parallel>], iteration_bounds = array<i64: 2>, scalar_prefetch = 0 : i64, scratch_operands = 1 : i64, tpu.core_type = #tpu.core_type<tc>, window_params = [{transform_indices = @transform_0, window_bounds = array<i64: 1, 4, 256>}, {pipeline_mode = #tpu.pipeline_mode<synchronous>, transform_indices = @transform_1, window_bounds = array<i64: 4, 1>}, {pipeline_mode = #tpu.pipeline_mode<synchronous>, transform_indices = @transform_2, window_bounds = array<i64: 4, 1>}, {pipeline_mode = #tpu.pipeline_mode<synchronous>, transform_indices = @transform_3, window_bounds = array<i64: 9, 4, 4>}, {pipeline_mode = #tpu.pipeline_mode<synchronous>, transform_indices = @transform_4, window_bounds = array<i64: 1, 256>}, {pipeline_mode = #tpu.pipeline_mode<synchronous>, transform_indices = @transform_5, window_bounds = array<i64: 1, 256>}, {transform_indices = @transform_6, window_bounds = array<i64: 1, 4, 256>}, {transform_indices = @transform_7, window_bounds = array<i64: 1, 4, 2>}]} {
    %c0 = arith.constant 0 : index
    %c0_0 = arith.constant 0 : index
    %c0_1 = arith.constant 0 : index
    %0 = vector.load %arg1[%c0, %c0_0, %c0_1] : memref<1x4x256xf32, #tpu.memory_space<vmem>>, vector<1x4x256xf32>
    %1 = vector.shape_cast %0 : vector<1x4x256xf32> to vector<4x256xf32>
    %c0_2 = arith.constant 0 : index
    %c0_3 = arith.constant 0 : index
    %2 = vector.load %arg2[%c0_2, %c0_3] : memref<4x1xf32, #tpu.memory_space<vmem>>, vector<4x1xf32>
    %3 = vector.broadcast %2 : vector<4x1xf32> to vector<4x256xf32>
    %4 = arith.mulf %1, %3 : vector<4x256xf32>
    %c0_4 = arith.constant 0 : index
    %c0_5 = arith.constant 0 : index
    %5 = vector.load %arg3[%c0_4, %c0_5] : memref<4x1xf32, #tpu.memory_space<vmem>>, vector<4x1xf32>
    %6 = vector.broadcast %5 : vector<4x1xf32> to vector<4x256xf32>
    %7 = arith.addf %4, %6 : vector<4x256xf32>
    %cst = arith.constant 0.000000e+00 : f32
    %8 = vector.broadcast %cst : f32 to vector<4x256xf32>
    %9 = arith.maximumf %7, %8 : vector<4x256xf32>
    %cst_6 = arith.constant 0.000000e+00 : f32
    %10 = vector.broadcast %cst_6 : f32 to vector<4x17xf32>
    %c0_7 = arith.constant 0 : index
    %c0_8 = arith.constant 0 : index
    %11 = vector.load %arg9[%c0_7, %c0_8] : memref<4x290xf32, #tpu.memory_space<vmem>>, vector<4x17xf32>
    tpu.vector_store %arg9[%c0_7, %c0_8], %10 {strides = array<i32>} : memref<4x290xf32, #tpu.memory_space<vmem>>, vector<4x17xf32>,
    %c0_9 = arith.constant 0 : index
    %c273 = arith.constant 273 : index
    %12 = vector.load %arg9[%c0_9, %c273] : memref<4x290xf32, #tpu.memory_space<vmem>>, vector<4x17xf32>
    tpu.vector_store %arg9[%c0_9, %c273], %10 {strides = array<i32>} : memref<4x290xf32, #tpu.memory_space<vmem>>, vector<4x17xf32>,
    %c0_10 = arith.constant 0 : index
    %c17 = arith.constant 17 : index
    %13 = vector.load %arg9[%c0_10, %c17] : memref<4x290xf32, #tpu.memory_space<vmem>>, vector<4x256xf32>
    tpu.vector_store %arg9[%c0_10, %c17], %9 {strides = array<i32>} : memref<4x290xf32, #tpu.memory_space<vmem>>, vector<4x256xf32>,
    %c1 = arith.constant 1 : index
    %c0_11 = arith.constant 0 : index
    %c0_12 = arith.constant 0 : index
    %14 = vector.load %arg4[%c1, %c0_11, %c0_12] : memref<9x4x4xf32, #tpu.memory_space<vmem>>, vector<1x4x4xf32>
    %15 = vector.shape_cast %14 : vector<1x4x4xf32> to vector<4x4xf32>
    %c0_13 = arith.constant 0 : index
    %c1_14 = arith.constant 1 : index
    %16 = vector.load %arg9[%c0_13, %c1_14] : memref<4x290xf32, #tpu.memory_space<vmem>>, vector<4x256xf32>
    %cst_15 = arith.constant dense<0.000000e+00> : vector<4x256xf32>
    %17 = tpu.matmul %15, %16, %cst_15 {dimension_numbers = #tpu.dot_dimension_numbers<[1], [0], [0], [1], [0, 0, 1, 1], [], []>} : vector<4x4xf32>, vector<4x256xf32>, vector<4x256xf32> -> vector<4x256xf32>
    %c4 = arith.constant 4 : index
    %c0_16 = arith.constant 0 : index
    %c0_17 = arith.constant 0 : index
    %18 = vector.load %arg4[%c4, %c0_16, %c0_17] : memref<9x4x4xf32, #tpu.memory_space<vmem>>, vector<1x4x4xf32>
    %19 = vector.shape_cast %18 : vector<1x4x4xf32> to vector<4x4xf32>
    %c0_18 = arith.constant 0 : index
    %c17_19 = arith.constant 17 : index
    %20 = vector.load %arg9[%c0_18, %c17_19] : memref<4x290xf32, #tpu.memory_space<vmem>>, vector<4x256xf32>
    %cst_20 = arith.constant dense<0.000000e+00> : vector<4x256xf32>
    %21 = tpu.matmul %19, %20, %cst_20 {dimension_numbers = #tpu.dot_dimension_numbers<[1], [0], [0], [1], [0, 0, 1, 1], [], []>} : vector<4x4xf32>, vector<4x256xf32>, vector<4x256xf32> -> vector<4x256xf32>
    %22 = arith.addf %17, %21 : vector<4x256xf32>
    %c7 = arith.constant 7 : index
    %c0_21 = arith.constant 0 : index
    %c0_22 = arith.constant 0 : index
    %23 = vector.load %arg4[%c7, %c0_21, %c0_22] : memref<9x4x4xf32, #tpu.memory_space<vmem>>, vector<1x4x4xf32>
    %24 = vector.shape_cast %23 : vector<1x4x4xf32> to vector<4x4xf32>
    %c0_23 = arith.constant 0 : index
    %c33 = arith.constant 33 : index
    %25 = vector.load %arg9[%c0_23, %c33] : memref<4x290xf32, #tpu.memory_space<vmem>>, vector<4x256xf32>
    %cst_24 = arith.constant dense<0.000000e+00> : vector<4x256xf32>
    %26 = tpu.matmul %24, %25, %cst_24 {dimension_numbers = #tpu.dot_dimension_numbers<[1], [0], [0], [1], [0, 0, 1, 1], [], []>} : vector<4x4xf32>, vector<4x256xf32>, vector<4x256xf32> -> vector<4x256xf32>
    %27 = arith.addf %22, %26 : vector<4x256xf32>
    %c0_25 = arith.constant 0 : index
    %c0_26 = arith.constant 0 : index
    %c0_27 = arith.constant 0 : index
    %28 = vector.load %arg4[%c0_25, %c0_26, %c0_27] : memref<9x4x4xf32, #tpu.memory_space<vmem>>, vector<1x4x4xf32>
    %29 = vector.shape_cast %28 : vector<1x4x4xf32> to vector<4x4xf32>
    %c0_28 = arith.constant 0 : index
    %c0_29 = arith.constant 0 : index
    %30 = vector.load %arg9[%c0_28, %c0_29] : memref<4x290xf32, #tpu.memory_space<vmem>>, vector<4x256xf32>
    %cst_30 = arith.constant dense<0.000000e+00> : vector<4x256xf32>
    %31 = tpu.matmul %29, %30, %cst_30 {dimension_numbers = #tpu.dot_dimension_numbers<[1], [0], [0], [1], [0, 0, 1, 1], [], []>} : vector<4x4xf32>, vector<4x256xf32>, vector<4x256xf32> -> vector<4x256xf32>
    %c3 = arith.constant 3 : index
    %c0_31 = arith.constant 0 : index
    %c0_32 = arith.constant 0 : index
    %32 = vector.load %arg4[%c3, %c0_31, %c0_32] : memref<9x4x4xf32, #tpu.memory_space<vmem>>, vector<1x4x4xf32>
    %33 = vector.shape_cast %32 : vector<1x4x4xf32> to vector<4x4xf32>
    %c0_33 = arith.constant 0 : index
    %c16 = arith.constant 16 : index
    %34 = vector.load %arg9[%c0_33, %c16] : memref<4x290xf32, #tpu.memory_space<vmem>>, vector<4x256xf32>
    %cst_34 = arith.constant dense<0.000000e+00> : vector<4x256xf32>
    %35 = tpu.matmul %33, %34, %cst_34 {dimension_numbers = #tpu.dot_dimension_numbers<[1], [0], [0], [1], [0, 0, 1, 1], [], []>} : vector<4x4xf32>, vector<4x256xf32>, vector<4x256xf32> -> vector<4x256xf32>
    %36 = arith.addf %31, %35 : vector<4x256xf32>
    %c6 = arith.constant 6 : index
    %c0_35 = arith.constant 0 : index
    %c0_36 = arith.constant 0 : index
    %37 = vector.load %arg4[%c6, %c0_35, %c0_36] : memref<9x4x4xf32, #tpu.memory_space<vmem>>, vector<1x4x4xf32>
    %38 = vector.shape_cast %37 : vector<1x4x4xf32> to vector<4x4xf32>
    %c0_37 = arith.constant 0 : index
    %c32 = arith.constant 32 : index
    %39 = vector.load %arg9[%c0_37, %c32] : memref<4x290xf32, #tpu.memory_space<vmem>>, vector<4x256xf32>
    %cst_38 = arith.constant dense<0.000000e+00> : vector<4x256xf32>
    %40 = tpu.matmul %38, %39, %cst_38 {dimension_numbers = #tpu.dot_dimension_numbers<[1], [0], [0], [1], [0, 0, 1, 1], [], []>} : vector<4x4xf32>, vector<4x256xf32>, vector<4x256xf32> -> vector<4x256xf32>
    %41 = arith.addf %36, %40 : vector<4x256xf32>
    %c0_39 = arith.constant 0 : index
    %c0_40 = arith.constant 0 : index
    %42 = vector.load %arg5[%c0_39, %c0_40] : memref<1x256xf32, #tpu.memory_space<vmem>>, vector<1x256xf32>
    %43 = vector.broadcast %42 : vector<1x256xf32> to vector<4x256xf32>
    %44 = arith.mulf %41, %43 : vector<4x256xf32>
    %45 = arith.addf %27, %44 : vector<4x256xf32>
    %c2 = arith.constant 2 : index
    %c0_41 = arith.constant 0 : index
    %c0_42 = arith.constant 0 : index
    %46 = vector.load %arg4[%c2, %c0_41, %c0_42] : memref<9x4x4xf32, #tpu.memory_space<vmem>>, vector<1x4x4xf32>
    %47 = vector.shape_cast %46 : vector<1x4x4xf32> to vector<4x4xf32>
    %c0_43 = arith.constant 0 : index
    %c2_44 = arith.constant 2 : index
    %48 = vector.load %arg9[%c0_43, %c2_44] : memref<4x290xf32, #tpu.memory_space<vmem>>, vector<4x256xf32>
    %cst_45 = arith.constant dense<0.000000e+00> : vector<4x256xf32>
    %49 = tpu.matmul %47, %48, %cst_45 {dimension_numbers = #tpu.dot_dimension_numbers<[1], [0], [0], [1], [0, 0, 1, 1], [], []>} : vector<4x4xf32>, vector<4x256xf32>, vector<4x256xf32> -> vector<4x256xf32>
    %c5 = arith.constant 5 : index
    %c0_46 = arith.constant 0 : index
    %c0_47 = arith.constant 0 : index
    %50 = vector.load %arg4[%c5, %c0_46, %c0_47] : memref<9x4x4xf32, #tpu.memory_space<vmem>>, vector<1x4x4xf32>
    %51 = vector.shape_cast %50 : vector<1x4x4xf32> to vector<4x4xf32>
    %c0_48 = arith.constant 0 : index
    %c18 = arith.constant 18 : index
    %52 = vector.load %arg9[%c0_48, %c18] : memref<4x290xf32, #tpu.memory_space<vmem>>, vector<4x256xf32>
    %cst_49 = arith.constant dense<0.000000e+00> : vector<4x256xf32>
    %53 = tpu.matmul %51, %52, %cst_49 {dimension_numbers = #tpu.dot_dimension_numbers<[1], [0], [0], [1], [0, 0, 1, 1], [], []>} : vector<4x4xf32>, vector<4x256xf32>, vector<4x256xf32> -> vector<4x256xf32>
    %54 = arith.addf %49, %53 : vector<4x256xf32>
    %c8 = arith.constant 8 : index
    %c0_50 = arith.constant 0 : index
    %c0_51 = arith.constant 0 : index
    %55 = vector.load %arg4[%c8, %c0_50, %c0_51] : memref<9x4x4xf32, #tpu.memory_space<vmem>>, vector<1x4x4xf32>
    %56 = vector.shape_cast %55 : vector<1x4x4xf32> to vector<4x4xf32>
    %c0_52 = arith.constant 0 : index
    %c34 = arith.constant 34 : index
    %57 = vector.load %arg9[%c0_52, %c34] : memref<4x290xf32, #tpu.memory_space<vmem>>, vector<4x256xf32>
    %cst_53 = arith.constant dense<0.000000e+00> : vector<4x256xf32>
    %58 = tpu.matmul %56, %57, %cst_53 {dimension_numbers = #tpu.dot_dimension_numbers<[1], [0], [0], [1], [0, 0, 1, 1], [], []>} : vector<4x4xf32>, vector<4x256xf32>, vector<4x256xf32> -> vector<4x256xf32>
    %59 = arith.addf %54, %58 : vector<4x256xf32>
    %c0_54 = arith.constant 0 : index
    %c0_55 = arith.constant 0 : index
    %60 = vector.load %arg6[%c0_54, %c0_55] : memref<1x256xf32, #tpu.memory_space<vmem>>, vector<1x256xf32>
    %61 = vector.broadcast %60 : vector<1x256xf32> to vector<4x256xf32>
    %62 = arith.mulf %59, %61 : vector<4x256xf32>
    %63 = arith.addf %45, %62 : vector<4x256xf32>
    %c0_56 = arith.constant 0 : index
    %c0_57 = arith.constant 0 : index
    %c0_58 = arith.constant 0 : index
    %64 = vector.load %arg7[%c0_56, %c0_57, %c0_58] : memref<1x4x256xf32, #tpu.memory_space<vmem>>, vector<1x4x256xf32>
    %65 = vector.shape_cast %64 : vector<1x4x256xf32> to vector<4x256xf32>
    %66 = vector.shape_cast %63 : vector<4x256xf32> to vector<1x4x256xf32>
    tpu.vector_store %arg7[%c0_56, %c0_57, %c0_58], %66 {strides = array<i32>} : memref<1x4x256xf32, #tpu.memory_space<vmem>>, vector<1x4x256xf32>,
    %cst_59 = arith.constant dense<0.000000e+00> : vector<4xf32>
    %67 = vector.multi_reduction <add>, %63, %cst_59 [1] : vector<4x256xf32> to vector<4xf32>
    %68 = vector.shape_cast %67 : vector<4xf32> to vector<4x1xf32>
    %cst_60 = arith.constant 3.906250e-03 : f32
    %69 = vector.broadcast %cst_60 : f32 to vector<4x1xf32>
    %70 = arith.mulf %68, %69 : vector<4x1xf32>
    %71 = vector.broadcast %70 : vector<4x1xf32> to vector<4x256xf32>
    %72 = arith.subf %63, %71 : vector<4x256xf32>
    %73 = vector.broadcast %70 : vector<4x1xf32> to vector<4x256xf32>
    %74 = arith.subf %63, %73 : vector<4x256xf32>
    %75 = arith.mulf %72, %74 : vector<4x256xf32>
    %cst_61 = arith.constant dense<0.000000e+00> : vector<4xf32>
    %76 = vector.multi_reduction <add>, %75, %cst_61 [1] : vector<4x256xf32> to vector<4xf32>
    %77 = vector.shape_cast %76 : vector<4xf32> to vector<4x1xf32>
    %78 = tpu.concatenate %68, %77 in 1 : vector<4x1xf32>, vector<4x1xf32> -> vector<4x2xf32>
    %c0_62 = arith.constant 0 : index
    %c0_63 = arith.constant 0 : index
    %c0_64 = arith.constant 0 : index
    %79 = vector.load %arg8[%c0_62, %c0_63, %c0_64] : memref<1x4x2xf32, #tpu.memory_space<vmem>>, vector<1x4x2xf32>
    %80 = vector.shape_cast %79 : vector<1x4x2xf32> to vector<4x2xf32>
    %81 = vector.shape_cast %78 : vector<4x2xf32> to vector<1x4x2xf32>
    tpu.vector_store %arg8[%c0_62, %c0_63, %c0_64], %81 {strides = array<i32>} : memref<1x4x2xf32, #tpu.memory_space<vmem>>, vector<1x4x2xf32>,
    return
  }
  func.func @transform_0(%arg0: i32) -> (i32, i32, i32) {
    %c0_i32 = arith.constant 0 : i32
    %c0_i32_0 = arith.constant 0 : i32
    %c0_i32_1 = arith.constant 0 : i32
    return %arg0, %c0_i32, %c0_i32_0 : i32, i32, i32
  }
  func.func @transform_1(%arg0: i32) -> (i32, i32) {
    %c0_i32 = arith.constant 0 : i32
    %c0_i32_0 = arith.constant 0 : i32
    %c0_i32_1 = arith.constant 0 : i32
    return %c0_i32, %c0_i32_0 : i32, i32
  }
  func.func @transform_2(%arg0: i32) -> (i32, i32) {
    %c0_i32 = arith.constant 0 : i32
    %c0_i32_0 = arith.constant 0 : i32
    %c0_i32_1 = arith.constant 0 : i32
    return %c0_i32, %c0_i32_0 : i32, i32
  }
  func.func @transform_3(%arg0: i32) -> (i32, i32, i32) {
    %c0_i32 = arith.constant 0 : i32
    %c0_i32_0 = arith.constant 0 : i32
    %c0_i32_1 = arith.constant 0 : i32
    %c0_i32_2 = arith.constant 0 : i32
    return %c0_i32, %c0_i32_0, %c0_i32_1 : i32, i32, i32
  }
  func.func @transform_4(%arg0: i32) -> (i32, i32) {
    %c0_i32 = arith.constant 0 : i32
    %c0_i32_0 = arith.constant 0 : i32
    %c0_i32_1 = arith.constant 0 : i32
    return %c0_i32, %c0_i32_0 : i32, i32
  }
  func.func @transform_5(%arg0: i32) -> (i32, i32) {
    %c0_i32 = arith.constant 0 : i32
    %c0_i32_0 = arith.constant 0 : i32
    %c0_i32_1 = arith.constant 0 : i32
    return %c0_i32, %c0_i32_0 : i32, i32
  }
  func.func @transform_6(%arg0: i32) -> (i32, i32, i32) {
    %c0_i32 = arith.constant 0 : i32
    %c0_i32_0 = arith.constant 0 : i32
    %c0_i32_1 = arith.constant 0 : i32
    return %arg0, %c0_i32, %c0_i32_0 : i32, i32, i32
  }
  func.func @transform_7(%arg0: i32) -> (i32, i32, i32) {
    %c0_i32 = arith.constant 0 : i32
    %c0_i32_0 = arith.constant 0 : i32
    %c0_i32_1 = arith.constant 0 : i32
    return %arg0, %c0_i32, %c0_i32_0 : i32, i32, i32
  }
}

module attributes {stable_mosaic.version = 11 : i64} {
  func.func @stage3_kernel(%arg0: i32, %arg1: memref<1x4x256xf32, #tpu.memory_space<vmem>>, %arg2: memref<4x1xf32, #tpu.memory_space<vmem>>, %arg3: memref<4x1xf32, #tpu.memory_space<vmem>>, %arg4: memref<16x4xf32, #tpu.memory_space<vmem>>, %arg5: memref<1x16x256xf32, #tpu.memory_space<vmem>>, %arg6: memref<1x16x2xf32, #tpu.memory_space<vmem>>) attributes {dimension_semantics = [#tpu.dimension_semantics<parallel>], iteration_bounds = array<i64: 2>, scalar_prefetch = 0 : i64, scratch_operands = 0 : i64, tpu.core_type = #tpu.core_type<tc>, window_params = [{transform_indices = @transform_0, window_bounds = array<i64: 1, 4, 256>}, {pipeline_mode = #tpu.pipeline_mode<synchronous>, transform_indices = @transform_1, window_bounds = array<i64: 4, 1>}, {pipeline_mode = #tpu.pipeline_mode<synchronous>, transform_indices = @transform_2, window_bounds = array<i64: 4, 1>}, {pipeline_mode = #tpu.pipeline_mode<synchronous>, transform_indices = @transform_3, window_bounds = array<i64: 16, 4>}, {transform_indices = @transform_4, window_bounds = array<i64: 1, 16, 256>}, {transform_indices = @transform_5, window_bounds = array<i64: 1, 16, 2>}]} {
    %c0 = arith.constant 0 : index
    %c0_0 = arith.constant 0 : index
    %c0_1 = arith.constant 0 : index
    %0 = vector.load %arg1[%c0, %c0_0, %c0_1] : memref<1x4x256xf32, #tpu.memory_space<vmem>>, vector<1x4x256xf32>
    %1 = vector.shape_cast %0 : vector<1x4x256xf32> to vector<4x256xf32>
    %c0_2 = arith.constant 0 : index
    %c0_3 = arith.constant 0 : index
    %2 = vector.load %arg2[%c0_2, %c0_3] : memref<4x1xf32, #tpu.memory_space<vmem>>, vector<4x1xf32>
    %3 = vector.broadcast %2 : vector<4x1xf32> to vector<4x256xf32>
    %4 = arith.mulf %1, %3 : vector<4x256xf32>
    %c0_4 = arith.constant 0 : index
    %c0_5 = arith.constant 0 : index
    %5 = vector.load %arg3[%c0_4, %c0_5] : memref<4x1xf32, #tpu.memory_space<vmem>>, vector<4x1xf32>
    %6 = vector.broadcast %5 : vector<4x1xf32> to vector<4x256xf32>
    %7 = arith.addf %4, %6 : vector<4x256xf32>
    %cst = arith.constant 0.000000e+00 : f32
    %8 = vector.broadcast %cst : f32 to vector<4x256xf32>
    %9 = arith.maximumf %7, %8 : vector<4x256xf32>
    %c0_6 = arith.constant 0 : index
    %c0_7 = arith.constant 0 : index
    %10 = vector.load %arg4[%c0_6, %c0_7] : memref<16x4xf32, #tpu.memory_space<vmem>>, vector<16x4xf32>
    %cst_8 = arith.constant dense<0.000000e+00> : vector<16x256xf32>
    %11 = tpu.matmul %10, %9, %cst_8 {dimension_numbers = #tpu.dot_dimension_numbers<[1], [0], [0], [1], [0, 0, 1, 1], [], []>} : vector<16x4xf32>, vector<4x256xf32>, vector<16x256xf32> -> vector<16x256xf32>
    %c0_9 = arith.constant 0 : index
    %c0_10 = arith.constant 0 : index
    %c0_11 = arith.constant 0 : index
    %12 = vector.load %arg5[%c0_9, %c0_10, %c0_11] : memref<1x16x256xf32, #tpu.memory_space<vmem>>, vector<1x16x256xf32>
    %13 = vector.shape_cast %12 : vector<1x16x256xf32> to vector<16x256xf32>
    %14 = vector.shape_cast %11 : vector<16x256xf32> to vector<1x16x256xf32>
    tpu.vector_store %arg5[%c0_9, %c0_10, %c0_11], %14 {strides = array<i32>} : memref<1x16x256xf32, #tpu.memory_space<vmem>>, vector<1x16x256xf32>,
    %cst_12 = arith.constant dense<0.000000e+00> : vector<16xf32>
    %15 = vector.multi_reduction <add>, %11, %cst_12 [1] : vector<16x256xf32> to vector<16xf32>
    %16 = vector.shape_cast %15 : vector<16xf32> to vector<16x1xf32>
    %cst_13 = arith.constant 3.906250e-03 : f32
    %17 = vector.broadcast %cst_13 : f32 to vector<16x1xf32>
    %18 = arith.mulf %16, %17 : vector<16x1xf32>
    %19 = vector.broadcast %18 : vector<16x1xf32> to vector<16x256xf32>
    %20 = arith.subf %11, %19 : vector<16x256xf32>
    %21 = vector.broadcast %18 : vector<16x1xf32> to vector<16x256xf32>
    %22 = arith.subf %11, %21 : vector<16x256xf32>
    %23 = arith.mulf %20, %22 : vector<16x256xf32>
    %cst_14 = arith.constant dense<0.000000e+00> : vector<16xf32>
    %24 = vector.multi_reduction <add>, %23, %cst_14 [1] : vector<16x256xf32> to vector<16xf32>
    %25 = vector.shape_cast %24 : vector<16xf32> to vector<16x1xf32>
    %26 = tpu.concatenate %16, %25 in 1 : vector<16x1xf32>, vector<16x1xf32> -> vector<16x2xf32>
    %c0_15 = arith.constant 0 : index
    %c0_16 = arith.constant 0 : index
    %c0_17 = arith.constant 0 : index
    %27 = vector.load %arg6[%c0_15, %c0_16, %c0_17] : memref<1x16x2xf32, #tpu.memory_space<vmem>>, vector<1x16x2xf32>
    %28 = vector.shape_cast %27 : vector<1x16x2xf32> to vector<16x2xf32>
    %29 = vector.shape_cast %26 : vector<16x2xf32> to vector<1x16x2xf32>
    tpu.vector_store %arg6[%c0_15, %c0_16, %c0_17], %29 {strides = array<i32>} : memref<1x16x2xf32, #tpu.memory_space<vmem>>, vector<1x16x2xf32>,
    return
  }
  func.func @transform_0(%arg0: i32) -> (i32, i32, i32) {
    %c0_i32 = arith.constant 0 : i32
    %c0_i32_0 = arith.constant 0 : i32
    %c0_i32_1 = arith.constant 0 : i32
    return %arg0, %c0_i32, %c0_i32_0 : i32, i32, i32
  }
  func.func @transform_1(%arg0: i32) -> (i32, i32) {
    %c0_i32 = arith.constant 0 : i32
    %c0_i32_0 = arith.constant 0 : i32
    %c0_i32_1 = arith.constant 0 : i32
    return %c0_i32, %c0_i32_0 : i32, i32
  }
  func.func @transform_2(%arg0: i32) -> (i32, i32) {
    %c0_i32 = arith.constant 0 : i32
    %c0_i32_0 = arith.constant 0 : i32
    %c0_i32_1 = arith.constant 0 : i32
    return %c0_i32, %c0_i32_0 : i32, i32
  }
  func.func @transform_3(%arg0: i32) -> (i32, i32) {
    %c0_i32 = arith.constant 0 : i32
    %c0_i32_0 = arith.constant 0 : i32
    %c0_i32_1 = arith.constant 0 : i32
    return %c0_i32, %c0_i32_0 : i32, i32
  }
  func.func @transform_4(%arg0: i32) -> (i32, i32, i32) {
    %c0_i32 = arith.constant 0 : i32
    %c0_i32_0 = arith.constant 0 : i32
    %c0_i32_1 = arith.constant 0 : i32
    return %arg0, %c0_i32, %c0_i32_0 : i32, i32, i32
  }
  func.func @transform_5(%arg0: i32) -> (i32, i32, i32) {
    %c0_i32 = arith.constant 0 : i32
    %c0_i32_0 = arith.constant 0 : i32
    %c0_i32_1 = arith.constant 0 : i32
    return %arg0, %c0_i32, %c0_i32_0 : i32, i32, i32
  }
}

module attributes {stable_mosaic.version = 11 : i64} {
  func.func @stage4_kernel(%arg0: i32, %arg1: memref<1x16x256xf32, #tpu.memory_space<vmem>>, %arg2: memref<1x16x256xf32, #tpu.memory_space<vmem>>, %arg3: memref<16x1xf32, #tpu.memory_space<vmem>>, %arg4: memref<16x1xf32, #tpu.memory_space<vmem>>, %arg5: memref<1x16x256xf32, #tpu.memory_space<vmem>>) attributes {dimension_semantics = [#tpu.dimension_semantics<parallel>], iteration_bounds = array<i64: 2>, scalar_prefetch = 0 : i64, scratch_operands = 0 : i64, tpu.core_type = #tpu.core_type<tc>, window_params = [{transform_indices = @transform_0, window_bounds = array<i64: 1, 16, 256>}, {transform_indices = @transform_1, window_bounds = array<i64: 1, 16, 256>}, {pipeline_mode = #tpu.pipeline_mode<synchronous>, transform_indices = @transform_2, window_bounds = array<i64: 16, 1>}, {pipeline_mode = #tpu.pipeline_mode<synchronous>, transform_indices = @transform_3, window_bounds = array<i64: 16, 1>}, {transform_indices = @transform_4, window_bounds = array<i64: 1, 16, 256>}]} {
    %c0 = arith.constant 0 : index
    %c0_0 = arith.constant 0 : index
    %c0_1 = arith.constant 0 : index
    %0 = vector.load %arg1[%c0, %c0_0, %c0_1] : memref<1x16x256xf32, #tpu.memory_space<vmem>>, vector<1x16x256xf32>
    %1 = vector.shape_cast %0 : vector<1x16x256xf32> to vector<16x256xf32>
    %c0_2 = arith.constant 0 : index
    %c0_3 = arith.constant 0 : index
    %c0_4 = arith.constant 0 : index
    %2 = vector.load %arg2[%c0_2, %c0_3, %c0_4] : memref<1x16x256xf32, #tpu.memory_space<vmem>>, vector<1x16x256xf32>
    %3 = vector.shape_cast %2 : vector<1x16x256xf32> to vector<16x256xf32>
    %c0_5 = arith.constant 0 : index
    %c0_6 = arith.constant 0 : index
    %4 = vector.load %arg3[%c0_5, %c0_6] : memref<16x1xf32, #tpu.memory_space<vmem>>, vector<16x1xf32>
    %5 = vector.broadcast %4 : vector<16x1xf32> to vector<16x256xf32>
    %6 = arith.mulf %1, %5 : vector<16x256xf32>
    %c0_7 = arith.constant 0 : index
    %c0_8 = arith.constant 0 : index
    %7 = vector.load %arg4[%c0_7, %c0_8] : memref<16x1xf32, #tpu.memory_space<vmem>>, vector<16x1xf32>
    %8 = vector.broadcast %7 : vector<16x1xf32> to vector<16x256xf32>
    %9 = arith.addf %6, %8 : vector<16x256xf32>
    %10 = arith.addf %9, %3 : vector<16x256xf32>
    %cst = arith.constant 0.000000e+00 : f32
    %11 = vector.broadcast %cst : f32 to vector<16x256xf32>
    %12 = arith.maximumf %10, %11 : vector<16x256xf32>
    %c0_9 = arith.constant 0 : index
    %c0_10 = arith.constant 0 : index
    %c0_11 = arith.constant 0 : index
    %13 = vector.load %arg5[%c0_9, %c0_10, %c0_11] : memref<1x16x256xf32, #tpu.memory_space<vmem>>, vector<1x16x256xf32>
    %14 = vector.shape_cast %13 : vector<1x16x256xf32> to vector<16x256xf32>
    %15 = vector.shape_cast %12 : vector<16x256xf32> to vector<1x16x256xf32>
    tpu.vector_store %arg5[%c0_9, %c0_10, %c0_11], %15 {strides = array<i32>} : memref<1x16x256xf32, #tpu.memory_space<vmem>>, vector<1x16x256xf32>,
    return
  }
  func.func @transform_0(%arg0: i32) -> (i32, i32, i32) {
    %c0_i32 = arith.constant 0 : i32
    %c0_i32_0 = arith.constant 0 : i32
    %c0_i32_1 = arith.constant 0 : i32
    return %arg0, %c0_i32, %c0_i32_0 : i32, i32, i32
  }
  func.func @transform_1(%arg0: i32) -> (i32, i32, i32) {
    %c0_i32 = arith.constant 0 : i32
    %c0_i32_0 = arith.constant 0 : i32
    %c0_i32_1 = arith.constant 0 : i32
    return %arg0, %c0_i32, %c0_i32_0 : i32, i32, i32
  }
  func.func @transform_2(%arg0: i32) -> (i32, i32) {
    %c0_i32 = arith.constant 0 : i32
    %c0_i32_0 = arith.constant 0 : i32
    %c0_i32_1 = arith.constant 0 : i32
    return %c0_i32, %c0_i32_0 : i32, i32
  }
  func.func @transform_3(%arg0: i32) -> (i32, i32) {
    %c0_i32 = arith.constant 0 : i32
    %c0_i32_0 = arith.constant 0 : i32
    %c0_i32_1 = arith.constant 0 : i32
    return %c0_i32, %c0_i32_0 : i32, i32
  }
  func.func @transform_4(%arg0: i32) -> (i32, i32, i32) {
    %c0_i32 = arith.constant 0 : i32
    %c0_i32_0 = arith.constant 0 : i32
    %c0_i32_1 = arith.constant 0 : i32
    return %arg0, %c0_i32, %c0_i32_0 : i32, i32, i32
  }
}

</mosaic_0001>

<bundles_post_ra>
// kernel: bottleneck_forward.4
= control target key start
LH: loop header
LB: loop body
LE: loop exit
PB: predicated region body
PF: predicated region fallthrough
CT: control target
= control target key end

     0   :  { %s430_s12 = smov 0   ;;  %s462_s0 = inlined_call_operand.vmem [shape: f32[2,16,256], index: 0, kind: input, shape index: {}]   ;;  %s463_s1 = inlined_call_operand.vmem [shape: f32[4,16], index: 1, kind: input, shape index: {}]   ;;  %s464_s2 = inlined_call_operand.vmem [shape: f32[2,4,256], index: 2, kind: output, shape index: {0}]   ;;  %s465_s3 = inlined_call_operand.vmem [shape: f32[2,4,2], index: 3, kind: output, shape index: {1}]  }
   0x1 LB: > { %s373_s13 = sadd.s32 4294967295, %s407_s12   ;;  %p377_p0 = scmp.ge.s32.totalorder %s407_s12, 1  ;;  %s407_s12 = sphi %s430_s12, %s14_s12  }
   0x2   : > { %p140_p1 = scmp.lt.s32.totalorder %s407_s12, 3 }
   0x4   : > { %p141_p2 = pnand %p377_p0, %p140_p1 }
   0x5   : > { %p168_p3 = scmp.lt.s32.totalorder (!%p141_p2), %s373_s13, 1  ;;  %v409_v0 = vmov (!%p141_p2), 0.0   ;;  %v186_v7 = vld [vmem:[%s463_s1] sm:$0xf] (!%p141_p2)  ;;  %vm187_vm0 = vcmask (!%p141_p2), 130048   ;;  %vm267_vm1 = vcmask (!%p141_p2), 1043456  }
   0x6   : > { %144 = sbr.rel (%p141_p2) target bundleno = 534 (0x216), region = 28  ;;  %255 = vmatprep.mubr.f32.mxu0 (!%p141_p2), %v409_v0  ;;  %vm283_vm2 = vcmask (!%p141_p2), 7168   ;;  %vm285_vm3 = vcmask (!%p141_p2), 11264  }
   0xd   : > { %s467_s13 = smov (!%p168_p3, %s373_s13), 1 }
   0xe   : > { %s386_s14 = sshll.u32 %s467_s13, 5  ;;  %s387_s20 = sshll.u32 %s467_s13, 3 }
   0xf   : > { %s172_s17 = scalar_lea.vmem %s462_s0, %s386_s14  ;;  %s177_s23 = scalar_lea.vmem %s464_s2, %s387_s20 }
  0x10   : > { %v183_v1 = vld [vmem:[%s172_s17 + $0x8] sm:$0xff]  ;;  %v185_v2 = vld [vmem:[%s172_s17 + $0x18] sm:$0xff]  ;;  %v182_v3 = vld [vmem:[%s172_s17] sm:$0xff]  ;;  %s382_s24 = sshll.u32 %s467_s13, 2 }
  0x11   : > { %v388_v4 = vpack.c.bf16 %v185_v2, %v183_v1  ;;  %v184_v5 = vld [vmem:[%s172_s17 + $0x10] sm:$0xff]  ;;  %s181_s27 = scalar_lea.vmem %s465_s3, %s382_s24 }
  0x12   : > { %v390_v6 = vpack.c.bf16 %v184_v5, %v182_v3 }
  0x13   : > { %389 = vmatprep.subr.bf16.mxu0 %v388_v4 }
  0x14   : > { %391 = vmatpush1.bf16.msra.mxu0 %v390_v6 }
  0x17   : > { %383 = vmatmul.mubr.msk.f32.vlgmr.msra.gmra.mrb[0].mxu0 %vm187_vm0, %v186_v7 }
  0xea   : > { %v257_v8 = vpop.f32.mrb[0].mxu0 }
  0xeb   : > { %v259_v9 = vpop.f32.mrb[1].mxu0  ;;  %v268_v10 = vsel %vm267_vm1, %v257_v8, 0.0 }
  0xec   : > { %v264_v11 = vcombine.low %v257_v8, %v259_v9  ;;  %v269_v12 = vsel %vm267_vm1, %v259_v9, 0.0 }
  0xed   : > { %v270_v13 = vadd.f32 %v269_v12, %v268_v10 }
  0xee   : > { %266 = vst [vmem:[%s177_s23] sm:$0xff] %v264_v11 }
  0xef   : > { %271 = vadd.xlane.f32.xlu0 %v270_v13 }
 0x17c   : > { %v272_v14 = vpop.xlane.xlu0 %271 }
 0x17d   : > { %v273_v15 = vmul.f32 0.00390625, %v272_v14 }
 0x17f   : > { %v274_v16 = vsub.f32 %v257_v8, %v273_v15  ;;  %v275_v17 = vsub.f32 %v259_v9, %v273_v15 }
 0x181   : > { %v276_v18 = vmul.f32 %v274_v16, %v274_v16  ;;  %v277_v19 = vmul.f32 %v275_v17, %v275_v17 }
 0x183   : > { %v278_v20 = vsel %vm267_vm1, %v276_v18, 0.0  ;;  %v279_v21 = vsel %vm267_vm1, %v277_v19, 0.0 }
 0x184   : > { %v280_v22 = vadd.f32 %v279_v21, %v278_v20 }
 0x186   : > { %281 = vadd.xlane.f32.xlu0 %v280_v22 }
 0x213   : > { %v282_v23 = vpop.xlane.xlu0 %281 }
 0x214   : > { %v284_v24 = vsel %vm283_vm2, %v272_v14, %v282_v23 }
 0x215   : > { %286 = vst.msk [vmem:[%s181_s27] sm:$0xf] %vm285_vm3, %v284_v24 }
 0x216 PF: > { %s14_s12 = sadd.s32 1, %s407_s12  }
 0x217   : > { %p11_p4 = scmp.ge.s32.totalorder %s14_s12, 4  }
 0x219   :  { %13 = sbr.rel (!%p11_p4) target bundleno = 1 (0x1), region = 70 }

// kernel: bottleneck_forward.6
= control target key start
LH: loop header
LB: loop body
LE: loop exit
PB: predicated region body
PF: predicated region fallthrough
CT: control target
= control target key end

     0   :  { %s556_s18 = smov 0   ;;  %s593_s0 = inlined_call_operand.vmem [shape: f32[2,4,256], index: 0, kind: input, shape index: {}]   ;;  %s594_s1 = inlined_call_operand.vmem [shape: f32[4,1], index: 1, kind: input, shape index: {}]   ;;  %s595_s2 = inlined_call_operand.vmem [shape: f32[4,1], index: 2, kind: input, shape index: {}]   ;;  %s596_s3 = inlined_call_operand.vmem [shape: f32[16,4], index: 3, kind: input, shape index: {}]   ;;  %s597_s4 = inlined_call_operand.vmem [shape: f32[2,16,256], index: 4, kind: output, shape index: {0}]   ;;  %s598_s5 = inlined_call_operand.vmem [shape: f32[2,16,2], index: 5, kind: output, shape index: {1}]  }
   0x1 LB: > { %s481_s19 = sadd.s32 4294967295, %s521_s18   ;;  %p485_p0 = scmp.ge.s32.totalorder %s521_s18, 1  ;;  %s521_s18 = sphi %s556_s18, %s16_s18  }
   0x2   : > { %p190_p1 = scmp.lt.s32.totalorder %s521_s18, 3 }
   0x4   : > { %p191_p2 = pnand %p485_p0, %p190_p1 }
   0x5   : > { %v239_v0 = vld [vmem:[%s594_s1] sm:$0xf] (!%p191_p2)  ;;  %v523_v1 = vmov (!%p191_p2), 0   ;;  %v524_v3 = vmov (!%p191_p2), 0.0   ;;  %p223_p3 = scmp.lt.s32.totalorder (!%p191_p2), %s481_s19, 1  ;;  %v247_v6 = vlaneseq (!%p191_p2)  ;;  %vm279_vm0 = vcmask (!%p191_p2), 1043456  }
   0x6   : > { %194 = sbr.rel (%p191_p2) target bundleno = 662 (0x296), region = 36  ;;  %514 = vset.pattern.permute.xlu0 (!%p191_p2), %v523_v1  ;;  %v253_v2 = vld [vmem:[%s595_s2] sm:$0xf] (!%p191_p2)  ;;  %348 = vmatprep.mubr.f32.mxu0 (!%p191_p2), %v524_v3  ;;  %v525_v4 = vmov (!%p191_p2), 839922192   ;;  %vm272_vm1 = vcmask (!%p191_p2), 31744  }
   0x7   : > { %242 = vperm.xlu0 (!%p191_p2), %514, %v239_v0   ;;  %354 = vmatprep.mubr.f32.mxu1 (!%p191_p2), %v524_v3  ;;  %v245_v5 = vunpack.c.l.s4 (!%p191_p2), %v525_v4  ;;  %v248_v8 = vshrl.u32 (!%p191_p2), %v247_v6, 7  ;;  %v268_v19 = vld [vmem:[%s596_s3] sm:$0xff] (!%p191_p2)  ;;  %v269_v20 = vld [vmem:[%s596_s3 + $0x8] sm:$0xff] (!%p191_p2)  ;;  %vm387_vm2 = vcmask (!%p191_p2), 7168   ;;  %vm390_vm3 = vcmask (!%p191_p2), 15360  }
   0x9   : > { %v246_v7 = vunpack.c.0.s8 (!%p191_p2), %v245_v5 }
   0xb   : > { %256 = vperm.xlu0 (!%p191_p2), %514, %v253_v2   ;;  %v249_v9 = vsub.s32 (!%p191_p2), %v246_v7, %v248_v8 }
   0xd   : > { %s600_s19 = smov (!%p223_p3, %s481_s19), 1 }
   0xe   : > { %s498_s24 = sshll.u32 %s600_s19, 3  ;;  %s499_s7 = sshll.u32 %s600_s19, 5 }
   0xf   : > { %s227_s27 = scalar_lea.vmem %s593_s0, %s498_s24  ;;  %s232_s10 = scalar_lea.vmem %s597_s4, %s499_s7 }
  0x10   : > { %v238_v12 = vld [vmem:[%s227_s27] sm:$0xff]  ;;  %s500_s11 = sshll.u32 %s600_s19, 4 }
  0x11   : > { %s237_s14 = scalar_lea.vmem %s598_s5, %s500_s11 }
  0x86   : > { %v243_v10 = vpop.permute.xlu0 %242 }
  0x87   : > { %v250_v11 = vrot.slane %v243_v10, %v249_v9 }
  0x89   : > { %v252_v14 = vmul.f32 %v250_v11, %v238_v12 }
  0x8a   : > { %v257_v13 = vpop.permute.xlu0 %256 }
  0x8b   : > { %v264_v15 = vrot.slane %v257_v13, %v249_v9 }
  0x8d   : > { %v266_v16 = vadd.f32 %v264_v15, %v252_v14 }
  0x8f   : > { %v267_v17 = vmax.f32 %v266_v16, 0.0 }
  0x91   : > { %v271_v18 = vcombine.high %v267_v17, %v267_v17 }
  0x93   : > { %492 = vmatprep.subr.msk.mxu0 %vm279_vm0, %v271_v18  ;;  %501 = vmatprep.subr.msk.mxu1 %vm279_vm0, %v271_v18 }
  0x94   : > { %493 = vmatpush1.msk.msra.mxu0 %vm279_vm0, %v267_v17  ;;  %502 = vmatpush1.msk.msra.mxu1 %vm279_vm0, %v267_v17 }
  0x95   : > { %494 = vmatmul.mubr.msk.f32.vlgmr.msra.gmra.mrb[0].mxu0 %vm272_vm1, %v268_v19  ;;  %495 = vmatmul.mubr.msk.f32.vlgmr.msra.gmra.mrb[0].mxu1 %vm272_vm1, %v269_v20 }
 0x168   : > { %v350_v21 = vpop.f32.mrb[0].mxu0  ;;  %v356_v22 = vpop.f32.mrb[0].mxu1 }
 0x169   : > { %361 = vst [vmem:[%s232_s10] sm:$0xff] %v350_v21  ;;  %v352_v23 = vpop.f32.mrb[1].mxu0  ;;  %363 = vst [vmem:[%s232_s10 + $0x10] sm:$0xff] %v356_v22  ;;  %v358_v24 = vpop.f32.mrb[1].mxu1 }
 0x16a   : > { %362 = vst [vmem:[%s232_s10 + $0x8] sm:$0xff] %v352_v23  ;;  %364 = vst [vmem:[%s232_s10 + $0x18] sm:$0xff] %v358_v24  ;;  %v365_v25 = vadd.f32 %v352_v23, %v350_v21  ;;  %v368_v26 = vadd.f32 %v358_v24, %v356_v22 }
 0x16c   : > { %366 = vadd.xlane.f32.xlu1 %v365_v25 }
 0x170   : > { %369 = vadd.xlane.f32.xlu1 %v368_v26 }
 0x1f9   : > { %v367_v27 = vpop.xlane.xlu1 %366 }
 0x1fa   : > { %v371_v28 = vmul.f32 0.00390625, %v367_v27 }
 0x1fc   : > { %v373_v29 = vsub.f32 %v350_v21, %v371_v28  ;;  %v374_v30 = vsub.f32 %v352_v23, %v371_v28 }
 0x1fd   : > { %v370_v31 = vpop.xlane.xlu1 %369 }
 0x1fe   : > { %v372_v32 = vmul.f32 0.00390625, %v370_v31  ;;  %v377_v33 = vmul.f32 %v373_v29, %v373_v29  ;;  %v378_v34 = vmul.f32 %v374_v30, %v374_v30 }
 0x200   : > { %v375_v35 = vsub.f32 %v356_v22, %v372_v32  ;;  %v376_v36 = vsub.f32 %v358_v24, %v372_v32  ;;  %v381_v37 = vadd.f32 %v378_v34, %v377_v33 }
 0x202   : > { %382 = vadd.xlane.f32.xlu0 %v381_v37  ;;  %v379_v38 = vmul.f32 %v375_v35, %v375_v35  ;;  %v380_v39 = vmul.f32 %v376_v36, %v376_v36 }
 0x204   : > { %v384_v40 = vadd.f32 %v380_v39, %v379_v38 }
 0x206   : > { %385 = vadd.xlane.f32.xlu1 %v384_v40 }
 0x28f   : > { %v383_v41 = vpop.xlane.xlu0 %382 }
 0x290   : > { %v388_v42 = vsel %vm387_vm2, %v367_v27, %v383_v41 }
 0x291   : > { %391 = vst.msk [vmem:[%s237_s14] sm:$0xff] %vm390_vm3, %v388_v42 }
 0x293   : > { %v386_v43 = vpop.xlane.xlu1 %385 }
 0x294   : > { %v389_v44 = vsel %vm387_vm2, %v370_v31, %v386_v43 }
 0x295   : > { %392 = vst.msk [vmem:[%s237_s14 + $0x8] sm:$0xff] %vm390_vm3, %v389_v44 }
 0x296 PF: > { %s16_s18 = sadd.s32 1, %s521_s18  }
 0x297   : > { %p13_p4 = scmp.ge.s32.totalorder %s16_s18, 4  }
 0x299   :  { %15 = sbr.rel (!%p13_p4) target bundleno = 1 (0x1), region = 78 }

// kernel: bottleneck_forward.7
= control target key start
LH: loop header
LB: loop body
LE: loop exit
PB: predicated region body
PF: predicated region fallthrough
CT: control target
= control target key end

     0   :  { %s398_s15 = smov 0   ;;  %s430_s0 = inlined_call_operand.vmem [shape: f32[2,16,256], index: 0, kind: input, shape index: {}, may-alias: {0,4}]   ;;  %s431_s1 = inlined_call_operand.vmem [shape: f32[2,16,256], index: 1, kind: input, shape index: {}]   ;;  %s432_s2 = inlined_call_operand.vmem [shape: f32[16,1], index: 2, kind: input, shape index: {}]   ;;  %s433_s3 = inlined_call_operand.vmem [shape: f32[16,1], index: 3, kind: input, shape index: {}]   ;;  %s434_s4 = inlined_call_operand.vmem [shape: f32[2,16,256], index: 4, kind: output, shape index: {}, may-alias: {0,4}]  }
   0x1 LB: > { %s337_s16 = sadd.s32 4294967295, %s370_s15   ;;  %p341_p0 = scmp.ge.s32.totalorder %s370_s15, 1  ;;  %s370_s15 = sphi %s398_s15, %s14_s15  }
   0x2   : > { %p172_p1 = scmp.lt.s32.totalorder %s370_s15, 3 }
   0x4   : > { %p173_p2 = pnand %p341_p0, %p172_p1 }
   0x5   : > { %v242_v0 = vld [vmem:[%s433_s3] sm:$0xff] (!%p173_p2)  ;;  %v372_v2 = vmov (!%p173_p2), 0   ;;  %v243_v3 = vld [vmem:[%s433_s3 + $0x8] sm:$0xff] (!%p173_p2)  ;;  %p203_p3 = scmp.lt.s32.totalorder (!%p173_p2), %s337_s16, 1 }
   0x6   : > { %176 = sbr.rel (%p173_p2) target bundleno = 148 (0x94), region = 36  ;;  %v226_v1 = vld [vmem:[%s432_s2] sm:$0xff] (!%p173_p2)  ;;  %363 = vset.pattern.permute.xlu1 (!%p173_p2), %v372_v2  ;;  %362 = vset.pattern.permute.xlu0 (!%p173_p2), %v372_v2  ;;  %v227_v4 = vld [vmem:[%s432_s2 + $0x8] sm:$0xff] (!%p173_p2) }
   0x7   : > { %246 = vperm.xlu1 (!%p173_p2), %363, %v242_v0   ;;  %230 = vperm.xlu0 (!%p173_p2), %362, %v226_v1  }
   0xb   : > { %251 = vperm.xlu1 (!%p173_p2), %363, %v243_v3   ;;  %235 = vperm.xlu0 (!%p173_p2), %362, %v227_v4  }
   0xd   : > { %s436_s16 = smov (!%p203_p3, %s337_s16), 1 }
   0xe   : > { %s350_s25 = sshll.u32 %s436_s16, 5 }
   0xf   : > { %s207_s28 = scalar_lea.vmem %s430_s0, %s350_s25  ;;  %s212_s5 = scalar_lea.vmem %s431_s1, %s350_s25 }
  0x10   : > { %v218_v5 = vld [vmem:[%s207_s28] sm:$0xff]  ;;  %v219_v6 = vld [vmem:[%s207_s28 + $0x8] sm:$0xff]  ;;  %v220_v13 = vld [vmem:[%s207_s28 + $0x10] sm:$0xff]  ;;  %s217_s8 = scalar_lea.vmem %s434_s4, %s350_s25 }
  0x11   : > { %v222_v9 = vld [vmem:[%s212_s5] sm:$0xff]  ;;  %v223_v12 = vld [vmem:[%s212_s5 + $0x8] sm:$0xff]  ;;  %v221_v14 = vld [vmem:[%s207_s28 + $0x18] sm:$0xff] }
  0x12   : > { %v224_v23 = vld [vmem:[%s212_s5 + $0x10] sm:$0xff]  ;;  %v225_v24 = vld [vmem:[%s212_s5 + $0x18] sm:$0xff] }
  0x86   : > { %v247_v7 = vpop.permute.xlu1 %246  ;;  %v231_v8 = vpop.permute.xlu0 %230 }
  0x87   : > { %v238_v10 = vmul.f32 %v231_v8, %v218_v5  ;;  %v239_v11 = vmul.f32 %v231_v8, %v219_v6 }
  0x89   : > { %v254_v15 = vadd.f32 %v247_v7, %v238_v10  ;;  %v255_v16 = vadd.f32 %v247_v7, %v239_v11 }
  0x8a   : > { %v236_v17 = vpop.permute.xlu0 %235  ;;  %v252_v22 = vpop.permute.xlu1 %251 }
  0x8b   : > { %v258_v18 = vadd.f32 %v254_v15, %v222_v9  ;;  %v259_v19 = vadd.f32 %v255_v16, %v223_v12  ;;  %v240_v20 = vmul.f32 %v236_v17, %v220_v13  ;;  %v241_v21 = vmul.f32 %v236_v17, %v221_v14 }
  0x8d   : > { %v262_v25 = vmax.f32 %v258_v18, 0.0  ;;  %v263_v26 = vmax.f32 %v259_v19, 0.0  ;;  %v256_v27 = vadd.f32 %v252_v22, %v240_v20  ;;  %v257_v28 = vadd.f32 %v252_v22, %v241_v21 }
  0x8f   : > { %v260_v29 = vadd.f32 %v256_v27, %v224_v23  ;;  %v261_v30 = vadd.f32 %v257_v28, %v225_v24  ;;  %266 = vst [vmem:[%s217_s8] sm:$0xff] %v262_v25  ;;  %267 = vst [vmem:[%s217_s8 + $0x8] sm:$0xff] %v263_v26 }
  0x91   : > { %v264_v31 = vmax.f32 %v260_v29, 0.0  ;;  %v265_v32 = vmax.f32 %v261_v30, 0.0 }
  0x93   : > { %268 = vst [vmem:[%s217_s8 + $0x10] sm:$0xff] %v264_v31  ;;  %269 = vst [vmem:[%s217_s8 + $0x18] sm:$0xff] %v265_v32 }
  0x94 PF: > { %s14_s15 = sadd.s32 1, %s370_s15  }
  0x95   : > { %p11_p4 = scmp.ge.s32.totalorder %s14_s15, 4  }
  0x97   :  { %13 = sbr.rel (!%p11_p4) target bundleno = 1 (0x1), region = 69 }

// kernel: bottleneck_forward.5
= control target key start
LH: loop header
LB: loop body
LE: loop exit
PB: predicated region body
PF: predicated region fallthrough
CT: control target
= control target key end

     0   :  { %s1451_s24 = smov 0   ;;  %s1591_s0 = inlined_call_operand.vmem [shape: f32[2,4,256], index: 0, kind: input, shape index: {}, may-alias: {0,6}]   ;;  %s1592_s1 = inlined_call_operand.vmem [shape: f32[4,1], index: 1, kind: input, shape index: {}]   ;;  %s1593_s2 = inlined_call_operand.vmem [shape: f32[4,1], index: 2, kind: input, shape index: {}]   ;;  %s1594_s3 = inlined_call_operand.vmem [shape: f32[9,4,4], index: 3, kind: input, shape index: {}]   ;;  %s1595_s4 = inlined_call_operand.vmem [shape: f32[1,256], index: 4, kind: input, shape index: {}]   ;;  %s1596_s5 = inlined_call_operand.vmem [shape: f32[1,256], index: 5, kind: input, shape index: {}]   ;;  %s1597_s6 = inlined_call_operand.vmem [shape: f32[2,4,256], index: 6, kind: output, shape index: {0}, may-alias: {0,6}]   ;;  %s1598_s7 = inlined_call_operand.vmem [shape: f32[2,4,2], index: 7, kind: output, shape index: {1}]  }
   0x1 LB: > { %s1308_s25 = sadd.s32 4294967295, %s1397_s24   ;;  %p1312_p0 = scmp.ge.s32.totalorder %s1397_s24, 1  ;;  %s1397_s24 = sphi %s1451_s24, %s18_s24  }
   0x2   : > { %p240_p1 = scmp.lt.s32.totalorder %s1397_s24, 3 }
   0x4   : > { %p241_p2 = pnand %p1312_p0, %p240_p1 }
   0x5   : > { %v291_v0 = vld [vmem:[%s1592_s1] sm:$0xf] (!%p241_p2)  ;;  %v1399_v1 = vmov (!%p241_p2), 0   ;;  %vm320_vm0 = vcmask (!%p241_p2), 134144   ;;  %vm322_vm1 = vcmask (!%p241_p2), 273544   ;;  %v1400_v3 = vmov (!%p241_p2), 0.0  }
   0x6   : > { %244 = sbr.rel (%p241_p2) target bundleno = 948 (0x3b4), region = 44  ;;  %1389 = vset.pattern.permute.xlu0 (!%p241_p2), %v1399_v1  ;;  %v305_v2 = vld [vmem:[%s1593_s2] sm:$0xf] (!%p241_p2)  ;;  %321 = vst.msk [vmem:[#allocation2] sm:$0xf] (!%p241_p2), %vm320_vm0, %v1400_v3  ;;  %515 = vmatprep.mubr.f32.mxu0 (!%p241_p2), %v1400_v3  ;;  %p276_p3 = scmp.lt.s32.totalorder (!%p241_p2), %s1308_s25, 1  ;;  %v299_v6 = vlaneseq (!%p241_p2) }
   0x7   : > { %294 = vperm.xlu0 (!%p241_p2), %1389, %v291_v0   ;;  %323 = vst.msk [vmem:[#allocation2 + $0x8] sm:$0xf] (!%p241_p2), %vm322_vm1, %v1400_v3  ;;  %428 = vmatprep.mubr.f32.mxu1 (!%p241_p2), %v1400_v3  ;;  %v1401_v4 = vmov (!%p241_p2), 839922192   ;;  %s1402_s11 = smov (!%p241_p2), 17   ;;  %vm332_vm2 = vcmask (!%p241_p2), 1043592  }
   0x8   : > { %v297_v5 = vunpack.c.l.s4 (!%p241_p2), %v1401_v4  ;;  %v1472_v8 = vshrl.u32 (!%p241_p2), %v299_v6, 7  ;;  %vm333_vm3 = vcmask (!%p241_p2), 1047556   ;;  %vm328_vm4 = vcmask (!%p241_p2), 138240   ;;  %s1403_s12 = smov (!%p241_p2), 111   ;;  %s1404_s13 = smov (!%p241_p2), 127  }
   0x9   : > { %vm334_vm5 = vmor (!%p241_p2), %vm333_vm3, %vm332_vm2  ;;  %s1405_s14 = smov (!%p241_p2), 112   ;;  %s1406_s15 = smov (!%p241_p2), 95   ;;  %vm441_vm6 = vcmask (!%p241_p2), 1039360   ;;  %vm359_vm7 = vcmask (!%p241_p2), 1043456   ;;  %v1318_v41 = vld [vmem:[%s1594_s3 + $0x4] sm:$0xf] (!%p241_p2) }
   0xa   : > { %v298_v7 = vunpack.c.0.s8 (!%p241_p2), %v297_v5  ;;  %s1407_s16 = smov (!%p241_p2), 110   ;;  %s1408_s17 = smov (!%p241_p2), 126   ;;  %vm355_vm8 = vcmask (!%p241_p2), 31744   ;;  %vm352_vm9 = vcmask (!%p241_p2), 908288   ;;  %v1319_v46 = vld [vmem:[%s1594_s3 + $0x10] sm:$0xf] (!%p241_p2) }
   0xb   : > { %308 = vperm.xlu0 (!%p241_p2), %1389, %v305_v2   ;;  %s1409_s18 = smov (!%p241_p2), 96   ;;  %s1410_s19 = smov (!%p241_p2), 94   ;;  %vm632_vm10 = vcmask (!%p241_p2), 916480   ;;  %vm535_vm11 = vcmask (!%p241_p2), 777216   ;;  %v1330_v53 = vld [vmem:[%s1594_s3 + $0xc] sm:$0xf] (!%p241_p2) }
   0xc   : > { %v301_v9 = vsub.s32 (!%p241_p2), %v298_v7, %v1472_v8  ;;  %v1326_v54 = vld [vmem:[%s1594_s3 + $0x1c] sm:$0xf] (!%p241_p2)  ;;  %vm918_vm12 = vcmask (!%p241_p2), 900096   ;;  %vm1005_vm13 = vcmask (!%p241_p2), 1031168   ;;  %v1342_v59 = vld [vmem:[%s1594_s3 + $0x14] sm:$0xf] (!%p241_p2) }
   0xd   : > { %s1600_s25 = smov (!%p276_p3, %s1308_s25), 1  ;;  %v618_v0 = vld [vmem:[%s1594_s3] sm:$0xf]  ;;  %v1341_v4 = vld [vmem:[%s1594_s3 + $0x8] sm:$0xf]  ;;  %vm804_vm14 = vcmask 785408  }
   0xe   : > { %s1355_s30 = sshll.u32 %s1600_s25, 3  ;;  %vm1099_vm15 = vcmask 769024   ;;  %vm1220_vm1 = vcmask 11264  }
   0xf   : > { %s280_s10 = scalar_lea.vmem %s1591_s0, %s1355_s30  ;;  %s285_s26 = scalar_lea.vmem %s1597_s6, %s1355_s30 }
  0x10   : > { %v290_v12 = vld [vmem:[%s280_s10] sm:$0xff]  ;;  %s1317_s30 = sshll.u32 %s1600_s25, 2 }
  0x11   : > { %s289_s29 = scalar_lea.vmem %s1598_s7, %s1317_s30 }
  0x86   : > { %v295_v10 = vpop.permute.xlu0 %294 }
  0x87   : > { %v302_v11 = vrot.slane %v295_v10, %v301_v9  ;;  %v1337_v10 = vld [vmem:[%s1594_s3 + $0x18] sm:$0xf] }
  0x89   : > { %v304_v14 = vmul.f32 %v302_v11, %v290_v12 }
  0x8a   : > { %v309_v13 = vpop.permute.xlu0 %308 }
  0x8b   : > { %v316_v15 = vrot.slane %v309_v13, %v301_v9 }
  0x8d   : > { %v318_v16 = vadd.f32 %v316_v15, %v304_v14  ;;  %v1349_v15 = vld [vmem:[%s1594_s3 + $0x20] sm:$0xf] }
  0x8f   : > { %v319_v17 = vmax.f32 %v318_v16, 0.0 }
  0x91   : > { %325 = vrot.lane.b32.xlu1 %v319_v17, %s1402_s11 }
 0x103   : > { %v326_v18 = vpop.permute.xlu1 %325 }
 0x104   : > { %v327_v19 = vrot.slane %v326_v18, 4 }
 0x106   : > { %v329_v20 = vsel %vm328_vm4, %v327_v19, %v326_v18  ;;  %336 = vst.msk [vmem:[#allocation2 + $0x8] sm:$0xf] %vm320_vm0, %v327_v19  ;;  %vm1218_vm0 = vcmask 7168  }
 0x107   : > { %335 = vst.msk [vmem:[#allocation2] sm:$0xff] %vm334_vm5, %v329_v20 }
 0x10d   : > { %v340_v21 = vld [vmem:[#allocation2 + $0x8] sm:$0xf] }
 0x10e   : > { %350 = vrot.lane.b32.xlu1 %v340_v21, %s1403_s12  ;;  %439 = vrot.lane.b32.xlu0 %v340_v21, %s1404_s13  ;;  %v622_v22 = vld [vmem:[#allocation2 + $0x8] sm:$0xf]  ;;  %v1482_v25 = vld [vmem:[#allocation2] sm:$0xff]  ;;  %v891_v21 = vsub.s32 0, %v1472_v8 }
 0x10f   : > { %v525_v23 = vld [vmem:[#allocation2 + $0x8] sm:$0xf]  ;;  %v1489_v26 = vcombine.high %v1482_v25, %v1482_v25 }
 0x110   : > { %v906_v24 = vld [vmem:[#allocation2 + $0x8] sm:$0xf] }
 0x111   : > { %v794_v27 = vld [vmem:[#allocation2 + $0x8] sm:$0xf] }
 0x112   : > { %630 = vrot.lane.b32.xlu1 %v622_v22, %s1405_s14  ;;  %533 = vrot.lane.b32.xlu0 %v525_v23, %s1406_s15  ;;  %v1089_v28 = vld [vmem:[#allocation2 + $0x8] sm:$0xf]  ;;  %v887_v22 = vld [vmem:[%s1595_s4] sm:$0x3]  ;;  %v895_v23 = vsub.s32 1, %v1472_v8 }
 0x116   : > { %916 = vrot.lane.b32.xlu0 %v906_v24, %s1407_s16  ;;  %435 = vrot.lane.b32.xlu1 %v1482_v25, %s1404_s13 }
 0x11a   : > { %346 = vrot.lane.b32.xlu0 %v1482_v25, %s1403_s12  ;;  %529 = vrot.lane.b32.xlu1 %v1482_v25, %s1406_s15 }
 0x11e   : > { %626 = vrot.lane.b32.xlu0 %v1482_v25, %s1405_s14  ;;  %437 = vrot.lane.b32.xlu1 %v1489_v26, %s1404_s13 }
 0x122   : > { %348 = vrot.lane.b32.xlu0 %v1489_v26, %s1403_s12  ;;  %912 = vrot.lane.b32.xlu1 %v1482_v25, %s1407_s16 }
 0x126   : > { %628 = vrot.lane.b32.xlu0 %v1489_v26, %s1405_s14  ;;  %531 = vrot.lane.b32.xlu1 %v1489_v26, %s1406_s15 }
 0x12a   : > { %999 = vrot.lane.b32.xlu0 %v1482_v25, %s1408_s17  ;;  %914 = vrot.lane.b32.xlu1 %v1489_v26, %s1407_s16 }
 0x12e   : > { %1001 = vrot.lane.b32.xlu0 %v1489_v26, %s1408_s17  ;;  %1003 = vrot.lane.b32.xlu1 %v906_v24, %s1408_s17  ;;  %v892_v24 = vrot.slane %v887_v22, %v891_v21 }
 0x132   : > { %802 = vrot.lane.b32.xlu0 %v794_v27, %s1409_s18  ;;  %798 = vrot.lane.b32.xlu1 %v1482_v25, %s1409_s18 }
 0x136   : > { %1095 = vrot.lane.b32.xlu0 %v1489_v26, %s1410_s19  ;;  %800 = vrot.lane.b32.xlu1 %v1489_v26, %s1409_s18 }
 0x13a   : > { %1093 = vrot.lane.b32.xlu0 %v1482_v25, %s1410_s19  ;;  %1097 = vrot.lane.b32.xlu1 %v1089_v28, %s1410_s19 }
 0x180   : > { %v351_v29 = vpop.permute.xlu1 %350  ;;  %v440_v30 = vpop.permute.xlu0 %439 }
 0x184   : > { %v631_v31 = vpop.permute.xlu1 %630  ;;  %v534_v32 = vpop.permute.xlu0 %533 }
 0x188   : > { %v917_v33 = vpop.permute.xlu0 %916  ;;  %v436_v34 = vpop.permute.xlu1 %435 }
 0x18c   : > { %v347_v35 = vpop.permute.xlu0 %346  ;;  %v530_v36 = vpop.permute.xlu1 %529 }
 0x190   : > { %v627_v37 = vpop.permute.xlu0 %626  ;;  %v438_v38 = vpop.permute.xlu1 %437 }
 0x191   : > { %v443_v39 = vsel %vm441_vm6, %v438_v38, %v440_v30  ;;  %v442_v40 = vsel %vm441_vm6, %v436_v34, %v438_v38 }
 0x192   : > { %1323 = vmatprep.subr.msk.mxu0 %vm359_vm7, %v443_v39 }
 0x193   : > { %1324 = vmatpush1.msk.msra.mxu0 %vm359_vm7, %v442_v40 }
 0x194   : > { %v349_v42 = vpop.permute.xlu0 %348  ;;  %1325 = vmatmul.mubr.msk.f32.vlgmr.msra.gmra.mrb[0].mxu0 %vm355_vm8, %v1318_v41  ;;  %v913_v43 = vpop.permute.xlu1 %912 }
 0x195   : > { %v354_v44 = vsel %vm352_vm9, %v349_v42, %v351_v29  ;;  %v353_v45 = vsel %vm352_vm9, %v347_v35, %v349_v42  ;;  %609 = vmatprep.mubr.f32.mxu0 %v1400_v3 }
 0x196   : > { %1320 = vmatprep.subr.msk.mxu1 %vm359_vm7, %v354_v44 }
 0x197   : > { %1321 = vmatpush1.msk.msra.mxu1 %vm359_vm7, %v353_v45 }
 0x198   : > { %1322 = vmatmul.mubr.msk.f32.vlgmr.msra.gmra.mrb[0].mxu1 %vm355_vm8, %v1319_v46  ;;  %v629_v47 = vpop.permute.xlu0 %628  ;;  %v532_v48 = vpop.permute.xlu1 %531 }
 0x199   : > { %v633_v49 = vsel %vm632_vm10, %v627_v37, %v629_v47  ;;  %v634_v50 = vsel %vm632_vm10, %v629_v47, %v631_v31  ;;  %v536_v51 = vsel %vm535_vm11, %v530_v36, %v532_v48  ;;  %v537_v52 = vsel %vm535_vm11, %v532_v48, %v534_v32  ;;  %706 = vmatprep.mubr.f32.mxu1 %v1400_v3 }
 0x19a   : > { %1327 = vmatprep.subr.msk.mxu0 %vm359_vm7, %v537_v52  ;;  %1331 = vmatprep.subr.msk.mxu1 %vm359_vm7, %v634_v50 }
 0x19b   : > { %1328 = vmatpush1.msk.msra.mxu0 %vm359_vm7, %v536_v51  ;;  %1332 = vmatpush1.msk.msra.mxu1 %vm359_vm7, %v633_v49 }
 0x19c   : > { %1333 = vmatmul.mubr.msk.f32.vlgmr.msra.gmra.mrb[2].mxu1 %vm355_vm8, %v1330_v53  ;;  %1334 = vmatprep.subr.msk.mxu1 %vm359_vm7, %v1489_v26  ;;  %v1000_v55 = vpop.permute.xlu0 %999  ;;  %v915_v56 = vpop.permute.xlu1 %914  ;;  %v1182_v26 = vld [vmem:[%s1596_s5] sm:$0x3] }
 0x19d   : > { %1329 = vmatmul.mubr.msk.f32.vlgmr.msra.gmra.mrb[0].mxu0 %vm355_vm8, %v1326_v54  ;;  %v919_v57 = vsel %vm918_vm12, %v913_v43, %v915_v56  ;;  %v920_v58 = vsel %vm918_vm12, %v915_v56, %v917_v33  ;;  %1335 = vmatpush1.msk.msra.mxu1 %vm359_vm7, %v1482_v25  ;;  %v896_v25 = vrot.slane %v887_v22, %v895_v23 }
 0x19e   : > { %1343 = vmatprep.subr.msk.mxu0 %vm359_vm7, %v920_v58  ;;  %992 = vmatprep.mubr.f32.mxu0 %v1400_v3  ;;  %v1187_v31 = vrot.slane %v1182_v26, %v891_v21  ;;  %v1191_v33 = vrot.slane %v1182_v26, %v895_v23 }
 0x19f   : > { %1344 = vmatpush1.msk.msra.mxu0 %vm359_vm7, %v919_v57  ;;  %784 = vmatprep.mubr.f32.mxu1 %v1400_v3 }
 0x1a0   : > { %v1002_v60 = vpop.permute.xlu0 %1001  ;;  %v1004_v61 = vpop.permute.xlu1 %1003 }
 0x1a1   : > { %v1006_v62 = vsel %vm1005_vm13, %v1000_v55, %v1002_v60  ;;  %1345 = vmatmul.mubr.msk.f32.vlgmr.msra.gmra.mrb[2].mxu0 %vm355_vm8, %v1342_v59  ;;  %v1007_v63 = vsel %vm1005_vm13, %v1002_v60, %v1004_v61 }
 0x1a2   : > { %1346 = vmatprep.subr.msk.mxu0 %vm359_vm7, %v1007_v63  ;;  %1079 = vmatprep.mubr.f32.mxu0 %v1400_v3 }
 0x1a3   : > { %1347 = vmatpush1.msk.msra.mxu0 %vm359_vm7, %v1006_v62 }
 0x1a4   : > { %1336 = vmatmul.mubr.msk.f32.vlgmr.msra.gmra.mrb[2].mxu1 %vm355_vm8, %v618_v0  ;;  %v803_v1 = vpop.permute.xlu0 %802  ;;  %v799_v2 = vpop.permute.xlu1 %798 }
 0x1a5   : > { %878 = vmatprep.mubr.f32.mxu1 %v1400_v3 }
 0x1a8   : > { %v1096_v5 = vpop.permute.xlu0 %1095  ;;  %v801_v6 = vpop.permute.xlu1 %800 }
 0x1a9   : > { %1348 = vmatmul.mubr.msk.f32.vlgmr.msra.gmra.mrb[2].mxu0 %vm355_vm8, %v1341_v4  ;;  %v805_v7 = vsel %vm804_vm14, %v799_v2, %v801_v6  ;;  %v806_v9 = vsel %vm804_vm14, %v801_v6, %v803_v1 }
 0x1aa   : > { %1338 = vmatprep.subr.msk.mxu1 %vm359_vm7, %v806_v9  ;;  %1173 = vmatprep.mubr.f32.mxu0 %v1400_v3 }
 0x1ab   : > { %1339 = vmatpush1.msk.msra.mxu1 %vm359_vm7, %v805_v7 }
 0x1ac   : > { %v1094_v11 = vpop.permute.xlu0 %1093  ;;  %1340 = vmatmul.mubr.msk.f32.vlgmr.msra.gmra.mrb[2].mxu1 %vm355_vm8, %v1337_v10  ;;  %v1098_v12 = vpop.permute.xlu1 %1097 }
 0x1ad   : > { %v1100_v13 = vsel %vm1099_vm15, %v1094_v11, %v1096_v5  ;;  %v1101_v14 = vsel %vm1099_vm15, %v1096_v5, %v1098_v12 }
 0x1ae   : > { %1350 = vmatprep.subr.msk.mxu0 %vm359_vm7, %v1101_v14 }
 0x1af   : > { %1351 = vmatpush1.msk.msra.mxu0 %vm359_vm7, %v1100_v13 }
 0x1b1   : > { %1352 = vmatmul.mubr.msk.f32.vlgmr.msra.gmra.mrb[2].mxu0 %vm355_vm8, %v1349_v15 }
 0x26b   : > { %v430_v16 = vpop.f32.mrb[0].mxu1 }
 0x26c   : > { %v432_v3 = vpop.f32.mrb[1].mxu1 }
 0x270   : > { %v611_v17 = vpop.f32.mrb[0].mxu0 }
 0x271   : > { %v1357_v18 = vadd.f32 %v611_v17, %v430_v16  ;;  %v613_v19 = vpop.f32.mrb[1].mxu0 }
 0x272   : > { %v1358_v20 = vadd.f32 %v613_v19, %v432_v3 }
 0x27f   : > { %v880_v27 = vpop.f32.mrb[2].mxu1 }
 0x280   : > { %v899_v28 = vmul.f32 %v892_v24, %v880_v27  ;;  %v882_v29 = vpop.f32.mrb[3].mxu1 }
 0x281   : > { %v900_v30 = vmul.f32 %v896_v25, %v882_v29 }
 0x282   : > { %v901_v32 = vadd.f32 %v1357_v18, %v899_v28 }
 0x283   : > { %v902_v34 = vadd.f32 %v1358_v20, %v900_v30 }
 0x284   : > { %v1175_v35 = vpop.f32.mrb[2].mxu0 }
 0x285   : > { %v1194_v36 = vmul.f32 %v1187_v31, %v1175_v35  ;;  %v1177_v37 = vpop.f32.mrb[3].mxu0 }
 0x286   : > { %v1195_v38 = vmul.f32 %v1191_v33, %v1177_v37 }
 0x287   : > { %v1196_v8 = vadd.f32 %v1194_v36, %v901_v32 }
 0x288   : > { %v1197_v39 = vadd.f32 %v1195_v38, %v902_v34 }
 0x289   : > { %v1203_v40 = vsel %vm359_vm7, %v1196_v8, 0.0 }
 0x28a   : > { %v1200_v41 = vcombine.low %v1196_v8, %v1197_v39  ;;  %v1204_v42 = vsel %vm359_vm7, %v1197_v39, 0.0 }
 0x28b   : > { %v1205_v43 = vadd.f32 %v1204_v42, %v1203_v40 }
 0x28c   : > { %1202 = vst [vmem:[%s285_s26] sm:$0xff] %v1200_v41 }
 0x28d   : > { %1206 = vadd.xlane.f32.xlu1 %v1205_v43 }
 0x31a   : > { %v1207_v44 = vpop.xlane.xlu1 %1206 }
 0x31b   : > { %v1208_v45 = vmul.f32 0.00390625, %v1207_v44 }
 0x31d   : > { %v1209_v46 = vsub.f32 %v1196_v8, %v1208_v45  ;;  %v1210_v47 = vsub.f32 %v1197_v39, %v1208_v45 }
 0x31f   : > { %v1211_v48 = vmul.f32 %v1209_v46, %v1209_v46  ;;  %v1212_v49 = vmul.f32 %v1210_v47, %v1210_v47 }
 0x321   : > { %v1213_v50 = vsel %vm359_vm7, %v1211_v48, 0.0  ;;  %v1214_v51 = vsel %vm359_vm7, %v1212_v49, 0.0 }
 0x322   : > { %v1215_v52 = vadd.f32 %v1214_v51, %v1213_v50 }
 0x324   : > { %1216 = vadd.xlane.f32.xlu0 %v1215_v52 }
 0x3b1   : > { %v1217_v53 = vpop.xlane.xlu0 %1216 }
 0x3b2   : > { %v1219_v54 = vsel %vm1218_vm0, %v1207_v44, %v1217_v53 }
 0x3b3   : > { %1221 = vst.msk [vmem:[%s289_s29] sm:$0xf] %vm1220_vm1, %v1219_v54 }
 0x3b4 PF: > { %s18_s24 = sadd.s32 1, %s1397_s24  }
 0x3b5   : > { %p15_p4 = scmp.ge.s32.totalorder %s18_s24, 4  }
 0x3b7   :  { %17 = sbr.rel (!%p15_p4) target bundleno = 1 (0x1), region = 94 }

</bundles_post_ra>
